<compile_context>
chip_gen: v7x
topology: tpu7x:2x2x1
jax: 0.10.0
libtpu: 0.0.40
codegen_flags: <defaults>
</compile_context>

<pallas_src>
import jax
import jax.numpy as jnp
from jax.experimental import pallas as pl
from jax.experimental.pallas import tpu as pltpu


def _pick_tile(hw):
    """Lane-aligned spatial tile, big enough to amortize per-step overhead."""
    for t in (2048, 1024, 512, 256, 128):
        if hw % t == 0:
            return t
    if hw >= 128:
        return 512 if hw > 512 else 128
    return hw  # tiny spatial extent: single (full-dim) tile


def baseline_forward(x_nchw, params, tile_hw=None):
    """x_nchw: (B, Cin, H, W) f32.  Returns (feat_1, feat_2): (B, C1), (B, C2)."""
    w2t, b2, w1t, b1 = params          # (C2,Cin) f32, (C2,1) f32, (C1,C2) bf16, (C1,1) f32
    B, Cin, H, W = x_nchw.shape
    HW = H * W
    C2 = w2t.shape[0]
    C1 = w1t.shape[0]

    # NCHW -> (B, Cin, HW): free reshape, HW on the lane axis (lane-dense DMA).
    x = x_nchw.reshape(B, Cin, HW)

    THW = tile_hw if tile_hw is not None else _pick_tile(HW)
    n_hw = -(-HW // THW)
    HW_pad = n_hw * THW
    if HW_pad != HW:
        x = jnp.pad(x, ((0, 0), (0, 0), (0, HW_pad - HW)))
    needs_mask = HW_pad != HW
    inv_hw = 1.0 / float(HW)

    def kernel(x_ref, w2_ref, b2_ref, w1_ref, b1_ref, f1_ref, f2_ref, acc1, acc2):
        hw = pl.program_id(1)

        @pl.when(hw == 0)
        def _init():
            acc1[...] = jnp.zeros_like(acc1)
            acc2[...] = jnp.zeros_like(acc2)

        xt = x_ref[0]                                        # (Cin, THW) f32

        # Stage A: K=Cin (=3) contraction as Cin broadcast-FMAs on the VPU,
        # keeping the MXU free (K=3 would be ~2% MXU utilization).
        h2 = w2_ref[:, 0:1] * xt[0:1, :]                     # (C2,1)*(1,THW)
        for c in range(1, Cin):
            h2 = h2 + w2_ref[:, c:c + 1] * xt[c:c + 1, :]
        h2 = jnp.maximum(h2 + b2_ref[...], 0.0)              # (C2, THW) f32

        # Stage B: big contraction over C2 on the MXU in bf16, f32 accumulate.
        h1 = jnp.dot(w1_ref[...], h2.astype(jnp.bfloat16),
                     preferred_element_type=jnp.float32)     # (C1, THW) f32
        h1 = jnp.maximum(h1 + b1_ref[...], 0.0)

        if needs_mask:  # ragged last tile: zero padded columns before the sum
            lane = jax.lax.broadcasted_iota(jnp.int32, (1, THW), 1)
            valid = (hw * THW + lane) < HW
            h1 = jnp.where(valid, h1, 0.0)
            h2 = jnp.where(valid, h2, 0.0)

        # GAP: accumulate f32 sums across HW tiles; scale once at the end.
        acc1[...] += jnp.sum(h1, axis=1, keepdims=True)      # (C1, 1)
        acc2[...] += jnp.sum(h2, axis=1, keepdims=True)      # (C2, 1)

        @pl.when(hw == n_hw - 1)
        def _finalize():
            f1_ref[0] = acc1[...] * inv_hw
            f2_ref[0] = acc2[...] * inv_hw

    # --- VMEM budget (generous 2x margin, floored/capped for all generations) ---
    def _ru(n, m):
        return ((n + m - 1) // m) * m

    f32b, bf16b = 4, 2
    tile_bytes = (
        2 * _ru(Cin, 8) * THW * f32b                            # x tile (double-buffered)
        + (C2 + C1) * THW * f32b + C2 * THW * bf16b             # h2, h1, bf16 copy of h2
        + 2 * (C2 * _ru(Cin, 128) * f32b + C1 * C2 * bf16b      # weights
               + (C1 + C2) * 128 * f32b)                        # biases (lane-padded)
        + 2 * (C1 + C2) * 128 * f32b                            # outputs (lane-padded)
        + (C1 + C2) * 128 * f32b                                # accumulators
    )
    vmem_bytes = min(max(2 * tile_bytes, 16 * 1024 * 1024), 48 * 1024 * 1024)

    flops = 2 * B * HW * (Cin * C2 + C2 * C1)
    bytes_accessed = (B * Cin * HW * 4 + C2 * Cin * 4 + C1 * C2 * 2
                      + (C1 + C2) * 4 + B * (C1 + C2) * 4)
    cost = pl.CostEstimate(flops=flops, transcendentals=0,
                           bytes_accessed=bytes_accessed)

    f1, f2 = pl.pallas_call(
        kernel,
        grid=(B, n_hw),
        in_specs=[
            pl.BlockSpec((1, Cin, THW), lambda b, h: (b, 0, h)),
            pl.BlockSpec((C2, Cin), lambda b, h: (0, 0)),
            pl.BlockSpec((C2, 1), lambda b, h: (0, 0)),
            pl.BlockSpec((C1, C2), lambda b, h: (0, 0)),
            pl.BlockSpec((C1, 1), lambda b, h: (0, 0)),
        ],
        out_specs=[
            pl.BlockSpec((1, C1, 1), lambda b, h: (b, 0, 0)),
            pl.BlockSpec((1, C2, 1), lambda b, h: (b, 0, 0)),
        ],
        out_shape=[
            jax.ShapeDtypeStruct((B, C1, 1), jnp.float32),
            jax.ShapeDtypeStruct((B, C2, 1), jnp.float32),
        ],
        scratch_shapes=[pltpu.VMEM((C1, 1), jnp.float32),
                        pltpu.VMEM((C2, 1), jnp.float32)],
        compiler_params=pltpu.CompilerParams(
            dimension_semantics=("parallel", "arbitrary"),
            vmem_limit_bytes=vmem_bytes),
        cost_estimate=cost,
    )(x, w2t, b2, w1t, b1)

    # .view(B, -1) equivalent (free reshape of the HBM result).
    return f1.reshape(B, C1), f2.reshape(B, C2)


def _reference(x_nchw, params):
    """Pure-JAX reference with matching compute dtypes (bf16 stage-B on MXU)."""
    w2t, b2, w1t_bf16, b1 = params
    B, Cin, H, W = x_nchw.shape
    x = x_nchw.reshape(B, Cin, H * W).astype(jnp.float32)
    h2 = jnp.maximum(jnp.einsum("dc,bcp->bdp", w2t, x) + b2[None], 0.0)
    h1 = jnp.einsum("ed,bdp->bep", w1t_bf16, h2.astype(jnp.bfloat16),
                    preferred_element_type=jnp.float32) + b1[None]
    h1 = jnp.maximum(h1, 0.0)
    return jnp.mean(h1, axis=2), jnp.mean(h2, axis=2)


def make_params(key, cin, c2, c1):
    k2, kb2, k1, kb1 = jax.random.split(key, 4)
    w2t = jax.random.normal(k2, (c2, cin), jnp.float32) * 0.1      # stage A (VPU, f32)
    b2 = jax.random.normal(kb2, (c2, 1), jnp.float32) * 0.01
    w1t = (jax.random.normal(k1, (c1, c2), jnp.float32) * 0.1).astype(jnp.bfloat16)
    b1 = jax.random.normal(kb1, (c1, 1), jnp.float32) * 0.01
    return w2t, b2, w1t, b1


if __name__ == "__main__":
    # Small shapes: batch=2, 3 input channels, 16x16 spatial.
    # C1/C2 are scaled-down stand-ins for the real 2048/1024 feature widths.
    B, Cin, H, W = 2, 3, 16, 16
    C2, C1 = 128, 256

    key = jax.random.PRNGKey(0)
    kx, kp = jax.random.split(key)
    x = jax.random.normal(kx, (B, Cin, H, W), jnp.float32)
    params = make_params(kp, Cin, C2, C1)

    # Exercise the HW-tiled accumulator path (HW=256 -> two 128-wide tiles).
    feat_1, feat_2 = jax.block_until_ready(baseline_forward(x, params, tile_hw=128))
    ref_1, ref_2 = _reference(x, params)
    assert feat_1.shape == (B, C1) and feat_2.shape == (B, C2)
    assert jnp.allclose(feat_1, ref_1, atol=1e-3, rtol=1e-3)
    assert jnp.allclose(feat_2, ref_2, atol=1e-3, rtol=1e-3)

    # Exercise the ragged-tail masked path (HW=144 -> pad to 256, mask 112 cols).
    x2 = jax.random.normal(jax.random.PRNGKey(1), (B, Cin, 12, 12), jnp.float32)
    g1, g2 = jax.block_until_ready(baseline_forward(x2, params, tile_hw=128))
    r1, r2 = _reference(x2, params)
    assert jnp.allclose(g1, r1, atol=1e-3, rtol=1e-3)
    assert jnp.allclose(g2, r2, atol=1e-3, rtol=1e-3)

    print("KERNEL_OK")
</pallas_src>

<mosaic_0001>
module attributes {stable_mosaic.version = 11 : i64} {
  func.func @kernel(%arg0: i32, %arg1: i32, %arg2: memref<1x3x128xf32, #tpu.memory_space<vmem>>, %arg3: memref<128x3xf32, #tpu.memory_space<vmem>>, %arg4: memref<128x1xf32, #tpu.memory_space<vmem>>, %arg5: memref<256x128xbf16, #tpu.memory_space<vmem>>, %arg6: memref<256x1xf32, #tpu.memory_space<vmem>>, %arg7: memref<1x256x1xf32, #tpu.memory_space<vmem>>, %arg8: memref<1x128x1xf32, #tpu.memory_space<vmem>>, %arg9: memref<256x1xf32, #tpu.memory_space<vmem>>, %arg10: memref<128x1xf32, #tpu.memory_space<vmem>>) attributes {dimension_semantics = [#tpu.dimension_semantics<parallel>, #tpu.dimension_semantics<arbitrary>], iteration_bounds = array<i64: 2, 2>, scalar_prefetch = 0 : i64, scratch_operands = 2 : i64, tpu.core_type = #tpu.core_type<tc>, window_params = [{transform_indices = @transform_0, window_bounds = array<i64: 1, 3, 128>}, {pipeline_mode = #tpu.pipeline_mode<synchronous>, transform_indices = @transform_1, window_bounds = array<i64: 128, 3>}, {pipeline_mode = #tpu.pipeline_mode<synchronous>, transform_indices = @transform_2, window_bounds = array<i64: 128, 1>}, {pipeline_mode = #tpu.pipeline_mode<synchronous>, transform_indices = @transform_3, window_bounds = array<i64: 256, 128>}, {pipeline_mode = #tpu.pipeline_mode<synchronous>, transform_indices = @transform_4, window_bounds = array<i64: 256, 1>}, {transform_indices = @transform_5, window_bounds = array<i64: 1, 256, 1>}, {transform_indices = @transform_6, window_bounds = array<i64: 1, 128, 1>}]} {
    %c0_i32 = arith.constant 0 : i32
    %0 = arith.cmpi eq, %arg1, %c0_i32 : i32
    %1 = arith.extui %0 : i1 to i32
    %c0_i32_0 = arith.constant 0 : i32
    %2 = arith.cmpi ne, %1, %c0_i32_0 : i32
    scf.if %2 {
      %cst_26 = arith.constant 0.000000e+00 : f32
      %48 = vector.broadcast %cst_26 : f32 to vector<256x1xf32>
      %c0_27 = arith.constant 0 : index
      %c0_28 = arith.constant 0 : index
      %49 = vector.load %arg9[%c0_27, %c0_28] : memref<256x1xf32, #tpu.memory_space<vmem>>, vector<256x1xf32>
      tpu.vector_store %arg9[%c0_27, %c0_28], %48 {strides = array<i32>} : memref<256x1xf32, #tpu.memory_space<vmem>>, vector<256x1xf32>,
      %cst_29 = arith.constant 0.000000e+00 : f32
      %50 = vector.broadcast %cst_29 : f32 to vector<128x1xf32>
      %c0_30 = arith.constant 0 : index
      %c0_31 = arith.constant 0 : index
      %51 = vector.load %arg10[%c0_30, %c0_31] : memref<128x1xf32, #tpu.memory_space<vmem>>, vector<128x1xf32>
      tpu.vector_store %arg10[%c0_30, %c0_31], %50 {strides = array<i32>} : memref<128x1xf32, #tpu.memory_space<vmem>>, vector<128x1xf32>,
    } else {
    }
    %c0 = arith.constant 0 : index
    %c0_1 = arith.constant 0 : index
    %c0_2 = arith.constant 0 : index
    %3 = vector.load %arg2[%c0, %c0_1, %c0_2] : memref<1x3x128xf32, #tpu.memory_space<vmem>>, vector<1x3x128xf32>
    %4 = vector.shape_cast %3 : vector<1x3x128xf32> to vector<3x128xf32>
    %c0_3 = arith.constant 0 : index
    %c0_4 = arith.constant 0 : index
    %5 = vector.load %arg3[%c0_3, %c0_4] : memref<128x3xf32, #tpu.memory_space<vmem>>, vector<128x1xf32>
    %6 = vector.extract_strided_slice %4 {offsets = [0, 0], sizes = [1, 128], strides = [1, 1]} : vector<3x128xf32> to vector<1x128xf32>
    %7 = vector.broadcast %5 : vector<128x1xf32> to vector<128x128xf32>
    %8 = vector.broadcast %6 : vector<1x128xf32> to vector<128x128xf32>
    %9 = arith.mulf %7, %8 : vector<128x128xf32>
    %c0_5 = arith.constant 0 : index
    %c1 = arith.constant 1 : index
    %10 = vector.load %arg3[%c0_5, %c1] : memref<128x3xf32, #tpu.memory_space<vmem>>, vector<128x1xf32>
    %11 = vector.extract_strided_slice %4 {offsets = [1, 0], sizes = [1, 128], strides = [1, 1]} : vector<3x128xf32> to vector<1x128xf32>
    %12 = vector.broadcast %10 : vector<128x1xf32> to vector<128x128xf32>
    %13 = vector.broadcast %11 : vector<1x128xf32> to vector<128x128xf32>
    %14 = arith.mulf %12, %13 : vector<128x128xf32>
    %15 = arith.addf %9, %14 : vector<128x128xf32>
    %c0_6 = arith.constant 0 : index
    %c2 = arith.constant 2 : index
    %16 = vector.load %arg3[%c0_6, %c2] : memref<128x3xf32, #tpu.memory_space<vmem>>, vector<128x1xf32>
    %17 = vector.extract_strided_slice %4 {offsets = [2, 0], sizes = [1, 128], strides = [1, 1]} : vector<3x128xf32> to vector<1x128xf32>
    %18 = vector.broadcast %16 : vector<128x1xf32> to vector<128x128xf32>
    %19 = vector.broadcast %17 : vector<1x128xf32> to vector<128x128xf32>
    %20 = arith.mulf %18, %19 : vector<128x128xf32>
    %21 = arith.addf %15, %20 : vector<128x128xf32>
    %c0_7 = arith.constant 0 : index
    %c0_8 = arith.constant 0 : index
    %22 = vector.load %arg4[%c0_7, %c0_8] : memref<128x1xf32, #tpu.memory_space<vmem>>, vector<128x1xf32>
    %23 = vector.broadcast %22 : vector<128x1xf32> to vector<128x128xf32>
    %24 = arith.addf %21, %23 : vector<128x128xf32>
    %cst = arith.constant 0.000000e+00 : f32
    %25 = vector.broadcast %cst : f32 to vector<128x128xf32>
    %26 = arith.maximumf %24, %25 : vector<128x128xf32>
    %c0_9 = arith.constant 0 : index
    %c0_10 = arith.constant 0 : index
    %27 = vector.load %arg5[%c0_9, %c0_10] : memref<256x128xbf16, #tpu.memory_space<vmem>>, vector<256x128xbf16>
    %28 = arith.truncf %26 : vector<128x128xf32> to vector<128x128xbf16>
    %cst_11 = arith.constant dense<0.000000e+00> : vector<256x128xf32>
    %29 = tpu.matmul %27, %28, %cst_11 {dimension_numbers = #tpu.dot_dimension_numbers<[1], [0], [0], [1], [0, 0, 1, 1], [], []>} : vector<256x128xbf16>, vector<128x128xbf16>, vector<256x128xf32> -> vector<256x128xf32>
    %c0_12 = arith.constant 0 : index
    %c0_13 = arith.constant 0 : index
    %30 = vector.load %arg6[%c0_12, %c0_13] : memref<256x1xf32, #tpu.memory_space<vmem>>, vector<256x1xf32>
    %31 = vector.broadcast %30 : vector<256x1xf32> to vector<256x128xf32>
    %32 = arith.addf %29, %31 : vector<256x128xf32>
    %cst_14 = arith.constant 0.000000e+00 : f32
    %33 = vector.broadcast %cst_14 : f32 to vector<256x128xf32>
    %34 = arith.maximumf %32, %33 : vector<256x128xf32>
    %c0_15 = arith.constant 0 : index
    %c0_16 = arith.constant 0 : index
    %35 = vector.load %arg9[%c0_15, %c0_16] : memref<256x1xf32, #tpu.memory_space<vmem>>, vector<256x1xf32>
    %cst_17 = arith.constant dense<0.000000e+00> : vector<256xf32>
    %36 = vector.multi_reduction <add>, %34, %cst_17 [1] : vector<256x128xf32> to vector<256xf32>
    %37 = vector.shape_cast %36 : vector<256xf32> to vector<256x1xf32>
    %38 = arith.addf %35, %37 : vector<256x1xf32>
    %c0_18 = arith.constant 0 : index
    %c0_19 = arith.constant 0 : index
    %39 = vector.load %arg9[%c0_18, %c0_19] : memref<256x1xf32, #tpu.memory_space<vmem>>, vector<256x1xf32>
    tpu.vector_store %arg9[%c0_18, %c0_19], %38 {strides = array<i32>} : memref<256x1xf32, #tpu.memory_space<vmem>>, vector<256x1xf32>,
    %c0_20 = arith.constant 0 : index
    %c0_21 = arith.constant 0 : index
    %40 = vector.load %arg10[%c0_20, %c0_21] : memref<128x1xf32, #tpu.memory_space<vmem>>, vector<128x1xf32>
    %cst_22 = arith.constant dense<0.000000e+00> : vector<128xf32>
    %41 = vector.multi_reduction <add>, %26, %cst_22 [1] : vector<128x128xf32> to vector<128xf32>
    %42 = vector.shape_cast %41 : vector<128xf32> to vector<128x1xf32>
    %43 = arith.addf %40, %42 : vector<128x1xf32>
    %c0_23 = arith.constant 0 : index
    %c0_24 = arith.constant 0 : index
    %44 = vector.load %arg10[%c0_23, %c0_24] : memref<128x1xf32, #tpu.memory_space<vmem>>, vector<128x1xf32>
    tpu.vector_store %arg10[%c0_23, %c0_24], %43 {strides = array<i32>} : memref<128x1xf32, #tpu.memory_space<vmem>>, vector<128x1xf32>,
    %c1_i32 = arith.constant 1 : i32
    %45 = arith.cmpi eq, %arg1, %c1_i32 : i32
    %46 = arith.extui %45 : i1 to i32
    %c0_i32_25 = arith.constant 0 : i32
    %47 = arith.cmpi ne, %46, %c0_i32_25 : i32
    scf.if %47 {
      %c0_26 = arith.constant 0 : index
      %c0_27 = arith.constant 0 : index
      %48 = vector.load %arg9[%c0_26, %c0_27] : memref<256x1xf32, #tpu.memory_space<vmem>>, vector<256x1xf32>
      %cst_28 = arith.constant 3.906250e-03 : f32
      %49 = vector.broadcast %cst_28 : f32 to vector<256x1xf32>
      %50 = arith.mulf %48, %49 : vector<256x1xf32>
      %c0_29 = arith.constant 0 : index
      %c0_30 = arith.constant 0 : index
      %c0_31 = arith.constant 0 : index
      %51 = vector.load %arg7[%c0_29, %c0_30, %c0_31] : memref<1x256x1xf32, #tpu.memory_space<vmem>>, vector<1x256x1xf32>
      %52 = vector.shape_cast %51 : vector<1x256x1xf32> to vector<256x1xf32>
      %53 = vector.shape_cast %50 : vector<256x1xf32> to vector<1x256x1xf32>
      tpu.vector_store %arg7[%c0_29, %c0_30, %c0_31], %53 {strides = array<i32>} : memref<1x256x1xf32, #tpu.memory_space<vmem>>, vector<1x256x1xf32>,
      %c0_32 = arith.constant 0 : index
      %c0_33 = arith.constant 0 : index
      %54 = vector.load %arg10[%c0_32, %c0_33] : memref<128x1xf32, #tpu.memory_space<vmem>>, vector<128x1xf32>
      %cst_34 = arith.constant 3.906250e-03 : f32
      %55 = vector.broadcast %cst_34 : f32 to vector<128x1xf32>
      %56 = arith.mulf %54, %55 : vector<128x1xf32>
      %c0_35 = arith.constant 0 : index
      %c0_36 = arith.constant 0 : index
      %c0_37 = arith.constant 0 : index
      %57 = vector.load %arg8[%c0_35, %c0_36, %c0_37] : memref<1x128x1xf32, #tpu.memory_space<vmem>>, vector<1x128x1xf32>
      %58 = vector.shape_cast %57 : vector<1x128x1xf32> to vector<128x1xf32>
      %59 = vector.shape_cast %56 : vector<128x1xf32> to vector<1x128x1xf32>
      tpu.vector_store %arg8[%c0_35, %c0_36, %c0_37], %59 {strides = array<i32>} : memref<1x128x1xf32, #tpu.memory_space<vmem>>, vector<1x128x1xf32>,
    } else {
    }
    return
  }
  func.func @transform_0(%arg0: i32, %arg1: i32) -> (i32, i32, i32) {
    %c0_i32 = arith.constant 0 : i32
    %c0_i32_0 = arith.constant 0 : i32
    return %arg0, %c0_i32, %arg1 : i32, i32, i32
  }
  func.func @transform_1(%arg0: i32, %arg1: i32) -> (i32, i32) {
    %c0_i32 = arith.constant 0 : i32
    %c0_i32_0 = arith.constant 0 : i32
    %c0_i32_1 = arith.constant 0 : i32
    return %c0_i32, %c0_i32_0 : i32, i32
  }
  func.func @transform_2(%arg0: i32, %arg1: i32) -> (i32, i32) {
    %c0_i32 = arith.constant 0 : i32
    %c0_i32_0 = arith.constant 0 : i32
    %c0_i32_1 = arith.constant 0 : i32
    return %c0_i32, %c0_i32_0 : i32, i32
  }
  func.func @transform_3(%arg0: i32, %arg1: i32) -> (i32, i32) {
    %c0_i32 = arith.constant 0 : i32
    %c0_i32_0 = arith.constant 0 : i32
    %c0_i32_1 = arith.constant 0 : i32
    return %c0_i32, %c0_i32_0 : i32, i32
  }
  func.func @transform_4(%arg0: i32, %arg1: i32) -> (i32, i32) {
    %c0_i32 = arith.constant 0 : i32
    %c0_i32_0 = arith.constant 0 : i32
    %c0_i32_1 = arith.constant 0 : i32
    return %c0_i32, %c0_i32_0 : i32, i32
  }
  func.func @transform_5(%arg0: i32, %arg1: i32) -> (i32, i32, i32) {
    %c0_i32 = arith.constant 0 : i32
    %c0_i32_0 = arith.constant 0 : i32
    %c0_i32_1 = arith.constant 0 : i32
    return %arg0, %c0_i32, %c0_i32_0 : i32, i32, i32
  }
  func.func @transform_6(%arg0: i32, %arg1: i32) -> (i32, i32, i32) {
    %c0_i32 = arith.constant 0 : i32
    %c0_i32_0 = arith.constant 0 : i32
    %c0_i32_1 = arith.constant 0 : i32
    return %arg0, %c0_i32, %c0_i32_0 : i32, i32, i32
  }
}

</mosaic_0001>

<bundles_post_ra>
// kernel: tpu_custom_call.1
= control target key start
LH: loop header
LB: loop body
LE: loop exit
PB: predicated region body
PF: predicated region fallthrough
CT: control target
= control target key end

     0   :  { %s2089_s21 = smov 0   ;;  %s2091_s22 = smov 0   ;;  %s2909_s0 = inlined_call_operand.vmem [shape: f32[2,3,256], index: 0, kind: input, shape index: {}]   ;;  %s2910_s1 = inlined_call_operand.vmem [shape: f32[128,3], index: 1, kind: input, shape index: {}]   ;;  %s2911_s2 = inlined_call_operand.vmem [shape: f32[128,1], index: 2, kind: input, shape index: {}]   ;;  %s2912_s3 = inlined_call_operand.vmem [shape: bf16[256,128], index: 3, kind: input, shape index: {}]   ;;  %s2913_s4 = inlined_call_operand.vmem [shape: f32[256,1], index: 4, kind: input, shape index: {}]   ;;  %s2914_s5 = inlined_call_operand.vmem [shape: f32[2,256,1], index: 5, kind: output, shape index: {0}]   ;;  %s2915_s6 = inlined_call_operand.vmem [shape: f32[2,128,1], index: 6, kind: output, shape index: {1}]  }
   0x1   :  { %s2093_s23 = smov 0   ;;  %s2095_s24 = smov 0  }
   0x2   :  { %s2097_s25 = smov 0  }
   0x3 LB: > { %s26_s26 = sadd.s32 1, %s2040_s23  ;;  %s29_s27 = sadd.s32 1, %s2044_s24  ;;  %s2048_s25 = sphi %s2097_s25, %s17_s25   ;;  %s2044_s24 = sphi %s2095_s24, %s2919_s24   ;;  %s2040_s23 = sphi %s2093_s23, %s2918_s23   ;;  %s2036_s22 = sphi %s2091_s22, %s2917_s22   ;;  %s2032_s21 = sphi %s2089_s21, %s2916_s21  }
   0x4   : > { %p27_p0 = scmp.ge.s32.totalorder %s26_s26, 2  ;;  %p1806_p1 = scmp.ge.s32.totalorder %s2048_s25, 1 }
   0x5   : > { %p232_p2 = scmp.lt.s32.totalorder %s2048_s25, 5 }
   0x6   : > { %s2921_s26 = smov (%p27_p0, %s26_s26), 0  ;;  %s2923_s27 = smov (!%p27_p0, %s29_s27), %s2044_s24 }
   0x7   : > { %p233_p3 = pnand %p1806_p1, %p232_p2  ;;  %p31_p4 = scmp.ge.s32.totalorder %s2923_s27, 2 }
   0x8   : > { %p270_p5 = scmp.lt.s32.totalorder (!%p233_p3), %s2036_s22, 1  ;;  %p272_p6 = scmp.lt.s32.totalorder (!%p233_p3), %s2032_s21, 1 }
   0x9   : > { %s2925_s27 = smov (%p31_p4, %s2923_s27), 0  ;;  %236 = sbr.rel (%p233_p3) target bundleno = 794 (0x31a), region = 40 }
   0xa   : > { %p1813_p7 = scmp.ne.s32.totalorder (!%p233_p3), %s2032_s21, 0 }
  0x10   : > { %s2927_s22 = smov (!%p270_p5, %s2036_s22), 1  ;;  %292 = sbr.rel (%p1813_p7) target bundleno = 43 (0x2b), region = 44 }
  0x11   : > { %s273_s28 = scalar_select %p272_p6, %s2032_s21, 1 }
  0x12   : > { %s1807_s29 = sshll.u32 %s2927_s22, 1  ;;  %s1833_s30 = sshll.u32 %s2927_s22, 8  ;;  %vm293_vm0 = vcmask (!%p1813_p7), 7168   ;;  %v2050_v0 = vmov (!%p1813_p7), 0.0  }
  0x13   : > { %s275_s7 = sadd.s32 %s1807_s29, %s273_s28  ;;  %s2126_s10 = scalar_lea.vmem %s2914_s5, %s1833_s30  ;;  %294 = vst.msk [vmem:[#allocation2] sm:$0xff] (!%p1813_p7), %vm293_vm0, %v2050_v0  ;;  %295 = vst.msk [vmem:[#allocation2 + $0x8] sm:$0xff] (!%p1813_p7), %vm293_vm0, %v2050_v0 }
  0x14   : > { %s1808_s11 = sshll.u32 %s275_s7, 2  ;;  %s1834_s12 = sshll.u32 %s2927_s22, 7  ;;  %296 = vst.msk [vmem:[#allocation2 + $0x10] sm:$0xff] (!%p1813_p7), %vm293_vm0, %v2050_v0  ;;  %297 = vst.msk [vmem:[#allocation2 + $0x18] sm:$0xff] (!%p1813_p7), %vm293_vm0, %v2050_v0 }
  0x15   : > { %s2131_s15 = scalar_lea.vmem %s2909_s0, %s1808_s11  ;;  %s2136_s18 = scalar_lea.vmem %s2915_s6, %s1834_s12  ;;  %298 = vst.msk [vmem:[#allocation2 + $0x20] sm:$0xff] (!%p1813_p7), %vm293_vm0, %v2050_v0  ;;  %299 = vst.msk [vmem:[#allocation2 + $0x28] sm:$0xff] (!%p1813_p7), %vm293_vm0, %v2050_v0 }
  0x16   : > { %300 = vst.msk [vmem:[#allocation2 + $0x30] sm:$0xff] (!%p1813_p7), %vm293_vm0, %v2050_v0  ;;  %301 = vst.msk [vmem:[#allocation2 + $0x38] sm:$0xff] (!%p1813_p7), %vm293_vm0, %v2050_v0 }
  0x17   : > { %302 = vst.msk [vmem:[#allocation2 + $0x40] sm:$0xff] %vm293_vm0, %v2050_v0  ;;  %303 = vst.msk [vmem:[#allocation2 + $0x48] sm:$0xff] %vm293_vm0, %v2050_v0 }
  0x18   : > { %304 = vst.msk [vmem:[#allocation2 + $0x50] sm:$0xff] %vm293_vm0, %v2050_v0  ;;  %305 = vst.msk [vmem:[#allocation2 + $0x58] sm:$0xff] %vm293_vm0, %v2050_v0 }
  0x19   : > { %306 = vst.msk [vmem:[#allocation2 + $0x60] sm:$0xff] %vm293_vm0, %v2050_v0  ;;  %307 = vst.msk [vmem:[#allocation2 + $0x68] sm:$0xff] %vm293_vm0, %v2050_v0 }
  0x1a   : > { %308 = vst.msk [vmem:[#allocation2 + $0x70] sm:$0xff] %vm293_vm0, %v2050_v0  ;;  %309 = vst.msk [vmem:[#allocation2 + $0x78] sm:$0xff] %vm293_vm0, %v2050_v0 }
  0x1b   : > { %310 = vst.msk [vmem:[#allocation2 + $0x80] sm:$0xff] %vm293_vm0, %v2050_v0  ;;  %311 = vst.msk [vmem:[#allocation2 + $0x88] sm:$0xff] %vm293_vm0, %v2050_v0 }
  0x1c   : > { %312 = vst.msk [vmem:[#allocation2 + $0x90] sm:$0xff] %vm293_vm0, %v2050_v0  ;;  %313 = vst.msk [vmem:[#allocation2 + $0x98] sm:$0xff] %vm293_vm0, %v2050_v0 }
  0x1d   : > { %314 = vst.msk [vmem:[#allocation2 + $0xa0] sm:$0xff] %vm293_vm0, %v2050_v0  ;;  %315 = vst.msk [vmem:[#allocation2 + $0xa8] sm:$0xff] %vm293_vm0, %v2050_v0 }
  0x1e   : > { %316 = vst.msk [vmem:[#allocation2 + $0xb0] sm:$0xff] %vm293_vm0, %v2050_v0  ;;  %317 = vst.msk [vmem:[#allocation2 + $0xb8] sm:$0xff] %vm293_vm0, %v2050_v0 }
  0x1f   : > { %318 = vst.msk [vmem:[#allocation2 + $0xc0] sm:$0xff] %vm293_vm0, %v2050_v0  ;;  %319 = vst.msk [vmem:[#allocation2 + $0xc8] sm:$0xff] %vm293_vm0, %v2050_v0 }
  0x20   : > { %320 = vst.msk [vmem:[#allocation2 + $0xd0] sm:$0xff] %vm293_vm0, %v2050_v0  ;;  %321 = vst.msk [vmem:[#allocation2 + $0xd8] sm:$0xff] %vm293_vm0, %v2050_v0 }
  0x21   : > { %322 = vst.msk [vmem:[#allocation2 + $0xe0] sm:$0xff] %vm293_vm0, %v2050_v0  ;;  %323 = vst.msk [vmem:[#allocation2 + $0xe8] sm:$0xff] %vm293_vm0, %v2050_v0 }
  0x22   : > { %324 = vst.msk [vmem:[#allocation2 + $0xf0] sm:$0xff] %vm293_vm0, %v2050_v0  ;;  %325 = vst.msk [vmem:[#allocation2 + $0xf8] sm:$0xff] %vm293_vm0, %v2050_v0 }
  0x23   : > { %326 = vst.msk [vmem:[#allocation3] sm:$0xff] %vm293_vm0, %v2050_v0  ;;  %327 = vst.msk [vmem:[#allocation3 + $0x8] sm:$0xff] %vm293_vm0, %v2050_v0 }
  0x24   : > { %328 = vst.msk [vmem:[#allocation3 + $0x10] sm:$0xff] %vm293_vm0, %v2050_v0  ;;  %329 = vst.msk [vmem:[#allocation3 + $0x18] sm:$0xff] %vm293_vm0, %v2050_v0 }
  0x25   : > { %330 = vst.msk [vmem:[#allocation3 + $0x20] sm:$0xff] %vm293_vm0, %v2050_v0  ;;  %331 = vst.msk [vmem:[#allocation3 + $0x28] sm:$0xff] %vm293_vm0, %v2050_v0 }
  0x26   : > { %332 = vst.msk [vmem:[#allocation3 + $0x30] sm:$0xff] %vm293_vm0, %v2050_v0  ;;  %333 = vst.msk [vmem:[#allocation3 + $0x38] sm:$0xff] %vm293_vm0, %v2050_v0 }
  0x27   : > { %334 = vst.msk [vmem:[#allocation3 + $0x40] sm:$0xff] %vm293_vm0, %v2050_v0  ;;  %335 = vst.msk [vmem:[#allocation3 + $0x48] sm:$0xff] %vm293_vm0, %v2050_v0 }
  0x28   : > { %336 = vst.msk [vmem:[#allocation3 + $0x50] sm:$0xff] %vm293_vm0, %v2050_v0  ;;  %337 = vst.msk [vmem:[#allocation3 + $0x58] sm:$0xff] %vm293_vm0, %v2050_v0 }
  0x29   : > { %338 = vst.msk [vmem:[#allocation3 + $0x60] sm:$0xff] %vm293_vm0, %v2050_v0  ;;  %339 = vst.msk [vmem:[#allocation3 + $0x68] sm:$0xff] %vm293_vm0, %v2050_v0 }
  0x2a   : > { %340 = vst.msk [vmem:[#allocation3 + $0x70] sm:$0xff] %vm293_vm0, %v2050_v0  ;;  %341 = vst.msk [vmem:[#allocation3 + $0x78] sm:$0xff] %vm293_vm0, %v2050_v0 }
  0x2b PF: > { %v345_v1 = vld [vmem:[%s2910_s1 + $0x10] sm:$0xff]  ;;  %v344_v2 = vld [vmem:[%s2910_s1 + $0x8] sm:$0xff]  ;;  %v2051_v3 = vmov 2   ;;  %v2052_v4 = vmov 0   ;;  %v346_v5 = vld [vmem:[%s2910_s1 + $0x18] sm:$0xff]  ;;  %v2053_v8 = vmov 1  }
  0x2c   : > { %1970 = vset.pattern.permute.xlu0 %v2051_v3  ;;  %1967 = vset.pattern.permute.xlu1 %v2052_v4  ;;  %v348_v6 = vld [vmem:[%s2910_s1 + $0x28] sm:$0xff]  ;;  %v343_v7 = vld [vmem:[%s2910_s1] sm:$0xff]  ;;  %v2208_v9 = vld [vmem:[%s2910_s1 + $0x38] sm:$0xff]  ;;  %vm1436_vm1 = vcmask 7168   ;;  %p1830_p8 = scmp.ne.s32.totalorder %s2032_s21, 1 }
  0x2d   : > { %371 = vperm.xlu1 %1967, %v345_v1   ;;  %564 = vperm.xlu0 %1970, %v344_v2   ;;  %v2214_v10 = vld [vmem:[%s2910_s1 + $0x48] sm:$0xff]  ;;  %v2221_v11 = vld [vmem:[%s2910_s1 + $0x58] sm:$0xff]  ;;  %v347_v14 = vld [vmem:[%s2910_s1 + $0x20] sm:$0xff] }
  0x2e   : > { %v2228_v12 = vld [vmem:[%s2910_s1 + $0x68] sm:$0xff]  ;;  %v2235_v13 = vld [vmem:[%s2910_s1 + $0x78] sm:$0xff]  ;;  %v349_v15 = vld [vmem:[%s2910_s1 + $0x30] sm:$0xff] }
  0x2f   : > { %v351_v16 = vld [vmem:[%s2910_s1 + $0x40] sm:$0xff]  ;;  %v660_v17 = vld [vmem:[%s2911_s2 + $0x8] sm:$0xff]  ;;  %v2260_v18 = vld [vmem:[%s2910_s1 + $0x50] sm:$0xff] }
  0x30   : > { %v2267_v19 = vld [vmem:[%s2910_s1 + $0x60] sm:$0xff]  ;;  %v2274_v20 = vld [vmem:[%s2910_s1 + $0x70] sm:$0xff]  ;;  %v662_v23 = vld [vmem:[%s2911_s2 + $0x18] sm:$0xff] }
  0x31   : > { %376 = vperm.xlu1 %1967, %v346_v5   ;;  %568 = vperm.xlu0 %1970, %v345_v1   ;;  %v659_v21 = vld [vmem:[%s2911_s2] sm:$0xff]  ;;  %v661_v22 = vld [vmem:[%s2911_s2 + $0x10] sm:$0xff]  ;;  %v664_v29 = vld [vmem:[%s2911_s2 + $0x28] sm:$0xff] }
  0x32   : > { %v663_v24 = vld [vmem:[%s2911_s2 + $0x20] sm:$0xff]  ;;  %v665_v25 = vld [vmem:[%s2911_s2 + $0x30] sm:$0xff]  ;;  %v674_v30 = vld [vmem:[%s2911_s2 + $0x78] sm:$0xff] }
  0x33   : > { %v667_v26 = vld [vmem:[%s2911_s2 + $0x40] sm:$0xff]  ;;  %v669_v27 = vld [vmem:[%s2911_s2 + $0x50] sm:$0xff]  ;;  %v828_v31 = vld [vmem:[%s2913_s4 + $0x8] sm:$0xff] }
  0x34   : > { %v671_v28 = vld [vmem:[%s2911_s2 + $0x60] sm:$0xff]  ;;  %v830_v32 = vld [vmem:[%s2913_s4 + $0x18] sm:$0xff]  ;;  %v832_v33 = vld [vmem:[%s2913_s4 + $0x28] sm:$0xff] }
  0x35   : > { %386 = vperm.xlu1 %1967, %v348_v6   ;;  %1972 = vset.pattern.permute.xlu0 %v2053_v8  ;;  %v834_v34 = vld [vmem:[%s2913_s4 + $0x38] sm:$0xff]  ;;  %v836_v36 = vld [vmem:[%s2913_s4 + $0x48] sm:$0xff] }
  0x36   : > { %460 = vperm.xlu0 %1972, %v343_v7   ;;  %v666_v35 = vld [vmem:[%s2911_s2 + $0x38] sm:$0xff]  ;;  %v840_v38 = vld [vmem:[%s2913_s4 + $0x68] sm:$0xff] }
  0x37   : > { %v838_v37 = vld [vmem:[%s2913_s4 + $0x58] sm:$0xff]  ;;  %v668_v42 = vld [vmem:[%s2911_s2 + $0x48] sm:$0xff] }
  0x38   : > { %v842_v41 = vld [vmem:[%s2913_s4 + $0x78] sm:$0xff]  ;;  %v844_v45 = vld [vmem:[%s2913_s4 + $0x88] sm:$0xff] }
  0x39   : > { %396 = vperm.xlu1 %1967, %v2208_v9   ;;  %v846_v47 = vld [vmem:[%s2913_s4 + $0x98] sm:$0xff]  ;;  %v848_v50 = vld [vmem:[%s2913_s4 + $0xa8] sm:$0xff] }
  0x3a   : > { %480 = vperm.xlu0 %1972, %v348_v6   ;;  %v850_v53 = vld [vmem:[%s2913_s4 + $0xb8] sm:$0xff]  ;;  %v852_v56 = vld [vmem:[%s2913_s4 + $0xc8] sm:$0xff] }
  0x3b   : > { %v670_v58 = vld [vmem:[%s2911_s2 + $0x58] sm:$0xff]  ;;  %v856_v63 = vld [vmem:[%s2913_s4 + $0xe8] sm:$0xff] }
  0x3c   : > { %v854_v60 = vld [vmem:[%s2913_s4 + $0xd8] sm:$0xff] }
  0x3d   : > { %406 = vperm.xlu1 %1967, %v2214_v10  }
  0x3e   : > { %488 = vperm.xlu0 %1972, %v2208_v9  }
  0x41   : > { %416 = vperm.xlu1 %1967, %v2221_v11  }
  0x42   : > { %496 = vperm.xlu0 %1972, %v2214_v10  }
  0x45   : > { %426 = vperm.xlu1 %1967, %v2228_v12  }
  0x46   : > { %504 = vperm.xlu0 %1972, %v2221_v11  }
  0x49   : > { %436 = vperm.xlu1 %1967, %v2235_v13  }
  0x4a   : > { %512 = vperm.xlu0 %1972, %v2228_v12  }
  0x4d   : > { %1968 = vset.pattern.permute.xlu1 %v2053_v8 }
  0x4e   : > { %464 = vperm.xlu1 %1968, %v344_v2   ;;  %520 = vperm.xlu0 %1972, %v2235_v13  }
  0x52   : > { %1969 = vset.pattern.permute.xlu1 %v2051_v3  ;;  %1991 = vset.pattern.permute.xlu0 %v2052_v4 }
  0x53   : > { %361 = vperm.xlu0 %1991, %v343_v7   ;;  %560 = vperm.xlu1 %1969, %v343_v7  }
  0x57   : > { %366 = vperm.xlu0 %1991, %v344_v2   ;;  %1971 = vset.pattern.permute.xlu1 %v2053_v8 }
  0x58   : > { %468 = vperm.xlu1 %1971, %v345_v1   ;;  %v858_v1 = vld [vmem:[%s2913_s4 + $0xf8] sm:$0xff] }
  0x5b   : > { %381 = vperm.xlu0 %1991, %v347_v14  }
  0x5c   : > { %472 = vperm.xlu1 %1971, %v346_v5  }
  0x5f   : > { %391 = vperm.xlu0 %1991, %v349_v15  }
  0x60   : > { %1973 = vset.pattern.permute.xlu1 %v2051_v3 }
  0x61   : > { %572 = vperm.xlu1 %1973, %v346_v5  }
  0x63   : > { %401 = vperm.xlu0 %1991, %v351_v16  }
  0x65   : > { %1974 = vset.pattern.permute.xlu1 %v2052_v4 }
  0x66   : > { %682 = vperm.xlu1 %1974, %v660_v17  }
  0x67   : > { %411 = vperm.xlu0 %1991, %v2260_v18  }
  0x6a   : > { %1975 = vset.pattern.permute.xlu1 %v2053_v8 }
  0x6b   : > { %421 = vperm.xlu0 %1991, %v2267_v19   ;;  %476 = vperm.xlu1 %1975, %v347_v14  }
  0x6f   : > { %431 = vperm.xlu0 %1991, %v2274_v20   ;;  %1976 = vset.pattern.permute.xlu1 %v2051_v3 }
  0x70   : > { %576 = vperm.xlu1 %1976, %v347_v14  }
  0x73   : > { %677 = vperm.xlu0 %1991, %v659_v21  }
  0x74   : > { %580 = vperm.xlu1 %1976, %v348_v6  }
  0x77   : > { %687 = vperm.xlu0 %1991, %v661_v22   ;;  %v1994_v22 = vld [vmem:[%s2912_s3] sm:$0xff]  }
  0x78   : > { %1977 = vset.pattern.permute.xlu1 %v2052_v4  ;;  %1875 = vmatprep.mubr.bf16.mxu0 %v1994_v22 }
  0x79   : > { %692 = vperm.xlu1 %1977, %v662_v23   ;;  %v1995_v23 = vld [vmem:[%s2912_s3 + $0x40] sm:$0xff]  }
  0x7a   : > { %1891 = vmatprep.mubr.bf16.mxu1 %v1995_v23 }
  0x7b   : > { %697 = vperm.xlu0 %1991, %v663_v24  }
  0x7d   : > { %1978 = vset.pattern.permute.xlu1 %v2053_v8 }
  0x7e   : > { %484 = vperm.xlu1 %1978, %v349_v15  }
  0x7f   : > { %707 = vperm.xlu0 %1991, %v665_v25  }
  0x82   : > { %1979 = vset.pattern.permute.xlu1 %v2051_v3 }
  0x83   : > { %717 = vperm.xlu0 %1991, %v667_v26   ;;  %584 = vperm.xlu1 %1979, %v349_v15  }
  0x87   : > { %727 = vperm.xlu0 %1991, %v669_v27   ;;  %588 = vperm.xlu1 %1979, %v2208_v9   ;;  %v831_v27 = vld [vmem:[%s2913_s4 + $0x20] sm:$0xff] }
  0x8b   : > { %737 = vperm.xlu0 %1991, %v671_v28   ;;  %1980 = vset.pattern.permute.xlu1 %v2052_v4 }
  0x8c   : > { %702 = vperm.xlu1 %1980, %v664_v29  }
  0x8f   : > { %752 = vperm.xlu0 %1991, %v674_v30  }
  0x90   : > { %1981 = vset.pattern.permute.xlu1 %v2053_v8 }
  0x91   : > { %492 = vperm.xlu1 %1981, %v351_v16  }
  0x93   : > { %866 = vperm.xlu0 %1991, %v828_v31  }
  0x95   : > { %1982 = vset.pattern.permute.xlu1 %v2051_v3 }
  0x96   : > { %592 = vperm.xlu1 %1982, %v351_v16  }
  0x97   : > { %876 = vperm.xlu0 %1991, %v830_v32  }
  0x9a   : > { %596 = vperm.xlu1 %1982, %v2214_v10  }
  0x9b   : > { %886 = vperm.xlu0 %1991, %v832_v33  }
  0x9e   : > { %1983 = vset.pattern.permute.xlu1 %v2052_v4 }
  0x9f   : > { %896 = vperm.xlu0 %1991, %v834_v34   ;;  %712 = vperm.xlu1 %1983, %v666_v35   ;;  %v833_v35 = vld [vmem:[%s2913_s4 + $0x30] sm:$0xff] }
  0xa3   : > { %906 = vperm.xlu0 %1991, %v836_v36   ;;  %1984 = vset.pattern.permute.xlu1 %v2053_v8 }
  0xa4   : > { %500 = vperm.xlu1 %1984, %v2260_v18  }
  0xa7   : > { %916 = vperm.xlu0 %1991, %v838_v37  }
  0xa8   : > { %1985 = vset.pattern.permute.xlu1 %v2051_v3 }
  0xa9   : > { %600 = vperm.xlu1 %1985, %v2260_v18   ;;  %v829_v18 = vld [vmem:[%s2913_s4 + $0x10] sm:$0xff] }
  0xab   : > { %926 = vperm.xlu0 %1991, %v840_v38  }
  0xac   : > { %v2345_v39 = vpop.permute.xlu1 %371  ;;  %v2347_v40 = vpop.permute.xlu0 %564 }
  0xad   : > { %604 = vperm.xlu1 %1985, %v2221_v11   ;;  %v439_v11 = vlaneseq }
  0xaf   : > { %936 = vperm.xlu0 %1991, %v842_v41   ;;  %v440_v15 = vshrl.u32 %v439_v11, 7 }
  0xb0   : > { %v2356_v43 = vpop.permute.xlu1 %376  ;;  %v2358_v44 = vpop.permute.xlu0 %568 }
  0xb1   : > { %1986 = vset.pattern.permute.xlu1 %v2052_v4  ;;  %v525_v21 = vsub.s32 1, %v440_v15  ;;  %v625_v25 = vsub.s32 2, %v440_v15 }
  0xb2   : > { %722 = vperm.xlu1 %1986, %v668_v42  }
  0xb3   : > { %946 = vperm.xlu0 %1991, %v844_v45  }
  0xb4   : > { %v2364_v46 = vpop.permute.xlu1 %386 }
  0xb5   : > { %v2369_v48 = vpop.permute.xlu0 %460 }
  0xb6   : > { %1987 = vset.pattern.permute.xlu1 %v2053_v8 }
  0xb7   : > { %956 = vperm.xlu0 %1991, %v846_v47   ;;  %508 = vperm.xlu1 %1987, %v2267_v19   ;;  %v835_v47 = vld [vmem:[%s2913_s4 + $0x40] sm:$0xff] }
  0xb8   : > { %v2373_v49 = vpop.permute.xlu1 %396 }
  0xb9   : > { %v2378_v51 = vpop.permute.xlu0 %480 }
  0xbb   : > { %966 = vperm.xlu0 %1991, %v848_v50   ;;  %1988 = vset.pattern.permute.xlu1 %v2051_v3 }
  0xbc   : > { %v2381_v52 = vpop.permute.xlu1 %406  ;;  %608 = vperm.xlu1 %1988, %v2267_v19   ;;  %v342_v19 = vld [vmem:[%s2131_s15] sm:$0x7] }
  0xbd   : > { %v2387_v54 = vpop.permute.xlu0 %488  ;;  %v2456_v29 = vrot.slane %v342_v19, %v525_v21  ;;  %v2459_v31 = vrot.slane %v342_v19, %v625_v25 }
  0xbf   : > { %976 = vperm.xlu0 %1991, %v850_v53   ;;  %v527_v32 = vmul.f32 %v2456_v29, %v2369_v48  ;;  %v628_v38 = vmul.f32 %v2459_v31, %v2347_v40  ;;  %v629_v40 = vmul.f32 %v2459_v31, %v2358_v44 }
  0xc0   : > { %v2389_v55 = vpop.permute.xlu1 %416  ;;  %612 = vperm.xlu1 %1988, %v2228_v12  }
  0xc1   : > { %v2395_v57 = vpop.permute.xlu0 %496 }
  0xc3   : > { %986 = vperm.xlu0 %1991, %v852_v56  }
  0xc4   : > { %v2400_v59 = vpop.permute.xlu1 %426  ;;  %1989 = vset.pattern.permute.xlu1 %v2052_v4 }
  0xc5   : > { %v2406_v61 = vpop.permute.xlu0 %504  ;;  %732 = vperm.xlu1 %1989, %v670_v58  }
  0xc7   : > { %996 = vperm.xlu0 %1991, %v854_v60  }
  0xc8   : > { %v2408_v62 = vpop.permute.xlu1 %436 }
  0xc9   : > { %v2413_v0 = vpop.permute.xlu0 %512  ;;  %1990 = vset.pattern.permute.xlu1 %v2053_v8  ;;  %v672_v8 = vld [vmem:[%s2911_s2 + $0x68] sm:$0xff] }
  0xca   : > { %516 = vperm.xlu1 %1990, %v2274_v20  }
  0xcb   : > { %1006 = vperm.xlu0 %1991, %v856_v63  }
  0xcd   : > { %v465_v2 = vpop.permute.xlu1 %464  ;;  %v2420_v5 = vpop.permute.xlu0 %520 }
  0xce   : > { %1992 = vset.pattern.permute.xlu1 %v2051_v3  ;;  %v673_v3 = vld [vmem:[%s2911_s2 + $0x70] sm:$0xff]  ;;  %v528_v33 = vmul.f32 %v2456_v29, %v465_v2 }
  0xcf   : > { %1016 = vperm.xlu0 %1991, %v858_v1   ;;  %616 = vperm.xlu1 %1992, %v2274_v20  }
  0xd2   : > { %v362_v6 = vpop.permute.xlu0 %361  ;;  %v561_v7 = vpop.permute.xlu1 %560 }
  0xd3   : > { %620 = vperm.xlu1 %1992, %v2235_v13   ;;  %v827_v13 = vld [vmem:[%s2913_s4] sm:$0xff]  ;;  %v627_v53 = vmul.f32 %v2459_v31, %v561_v7 }
  0xd6   : > { %v367_v9 = vpop.permute.xlu0 %366 }
  0xd7   : > { %1993 = vset.pattern.permute.xlu1 %v2052_v4  ;;  %v469_v10 = vpop.permute.xlu1 %468  ;;  %v441_v4 = vsub.s32 0, %v440_v15 }
  0xd8   : > { %742 = vperm.xlu1 %1993, %v672_v8   ;;  %v529_v42 = vmul.f32 %v2456_v29, %v469_v10 }
  0xd9   : > { %v2449_v24 = vrot.slane %v342_v19, %v441_v4 }
  0xda   : > { %v382_v12 = vpop.permute.xlu0 %381 }
  0xdb   : > { %v473_v14 = vpop.permute.xlu1 %472  ;;  %v444_v30 = vmul.f32 %v2449_v24, %v367_v9  ;;  %v443_v34 = vmul.f32 %v2449_v24, %v362_v6  ;;  %v445_v48 = vmul.f32 %v2449_v24, %v2345_v39  ;;  %v837_v39 = vld [vmem:[%s2913_s4 + $0x50] sm:$0xff]  ;;  %v446_v6 = vmul.f32 %v2449_v24, %v2356_v43  ;;  %v839_v43 = vld [vmem:[%s2913_s4 + $0x60] sm:$0xff] }
  0xdc   : > { %747 = vperm.xlu1 %1993, %v673_v3   ;;  %v530_v63 = vmul.f32 %v2456_v29, %v473_v14  ;;  %v447_v8 = vmul.f32 %v2449_v24, %v382_v12 }
  0xdd   : > { %v544_v41 = vadd.f32 %v528_v33, %v444_v30  ;;  %v543_v45 = vadd.f32 %v527_v32, %v443_v34  ;;  %v545_v60 = vadd.f32 %v529_v42, %v445_v48 }
  0xde   : > { %v2435_v16 = vpop.permute.xlu0 %391  ;;  %v546_v14 = vadd.f32 %v530_v63, %v446_v6 }
  0xdf   : > { %v644_v56 = vadd.f32 %v628_v38, %v544_v41  ;;  %v643_v2 = vadd.f32 %v627_v53, %v543_v45  ;;  %v645_v3 = vadd.f32 %v629_v40, %v545_v60  ;;  %v843_v38 = vld [vmem:[%s2913_s4 + $0x80] sm:$0xff]  ;;  %v449_v41 = vmul.f32 %v2449_v24, %v2435_v16  ;;  %v845_v45 = vld [vmem:[%s2913_s4 + $0x90] sm:$0xff] }
  0xe0   : > { %861 = vperm.xlu1 %1993, %v827_v13   ;;  %v573_v17 = vpop.permute.xlu1 %572  ;;  %v448_v40 = vmul.f32 %v2449_v24, %v2364_v46  ;;  %v851_v46 = vld [vmem:[%s2913_s4 + $0xc0] sm:$0xff] }
  0xe1   : > { %v630_v9 = vmul.f32 %v2459_v31, %v573_v17 }
  0xe2   : > { %v2441_v20 = vpop.permute.xlu0 %401 }
  0xe3   : > { %v646_v21 = vadd.f32 %v630_v9, %v546_v14 }
  0xe4   : > { %871 = vperm.xlu1 %1993, %v829_v18  }
  0xe5   : > { %v683_v26 = vpop.permute.xlu1 %682 }
  0xe6   : > { %v2454_v28 = vpop.permute.xlu0 %411  ;;  %v2484_v1 = vadd.f32 %v683_v26, %v644_v56  ;;  %v532_v56 = vmul.f32 %v2456_v29, %v2378_v51  ;;  %v849_v51 = vld [vmem:[%s2913_s4 + $0xb0] sm:$0xff] }
  0xe8   : > { %881 = vperm.xlu1 %1993, %v831_v27   ;;  %v772_v15 = vmax.f32 %v2484_v1, 0.0  ;;  %v841_v27 = vld [vmem:[%s2913_s4 + $0x70] sm:$0xff]  ;;  %v548_v6 = vadd.f32 %v532_v56, %v448_v40  ;;  %v453_v56 = vmul.f32 %v2449_v24, %v2454_v28 }
  0xea   : > { %v2468_v36 = vpop.permute.xlu0 %421  ;;  %v477_v37 = vpop.permute.xlu1 %476 }
  0xeb   : > { %v531_v44 = vmul.f32 %v2456_v29, %v477_v37 }
  0xec   : > { %891 = vperm.xlu1 %1993, %v833_v35  }
  0xed   : > { %v547_v12 = vadd.f32 %v531_v44, %v447_v8 }
  0xee   : > { %v2478_v50 = vpop.permute.xlu0 %431 }
  0xef   : > { %v577_v58 = vpop.permute.xlu1 %576 }
  0xf0   : > { %901 = vperm.xlu1 %1993, %v835_v47   ;;  %v631_v13 = vmul.f32 %v2459_v31, %v577_v58  ;;  %v847_v58 = vld [vmem:[%s2913_s4 + $0xa0] sm:$0xff] }
  0xf2   : > { %v678_v7 = vpop.permute.xlu0 %677  ;;  %v647_v26 = vadd.f32 %v631_v13, %v547_v12  ;;  %v853_v13 = vld [vmem:[%s2913_s4 + $0xd0] sm:$0xff] }
  0xf3   : > { %v755_v10 = vadd.f32 %v678_v7, %v643_v2  ;;  %v581_v11 = vpop.permute.xlu1 %580 }
  0xf4   : > { %911 = vperm.xlu1 %1993, %v837_v39   ;;  %v632_v60 = vmul.f32 %v2459_v31, %v581_v11 }
  0xf5   : > { %v771_v4 = vmax.f32 %v755_v10, 0.0 }
  0xf6   : > { %v688_v18 = vpop.permute.xlu0 %687  ;;  %v648_v8 = vadd.f32 %v632_v60, %v548_v6  ;;  %v536_v60 = vmul.f32 %v2456_v29, %v2395_v57 }
  0xf7   : > { %v819_v17 = vpack.c.bf16 %v772_v15, %v771_v4  ;;  %v757_v19 = vadd.f32 %v688_v18, %v645_v3  ;;  %1485 = vadd.xlane.f32.xlu0 %v771_v4  ;;  %v451_v4 = vmul.f32 %v2449_v24, %v2441_v20 }
  0xf8   : > { %921 = vperm.xlu1 %1993, %v839_v43   ;;  %v693_v22 = vpop.permute.xlu1 %692 }
  0xf9   : > { %v773_v23 = vmax.f32 %v757_v19, 0.0  ;;  %v2501_v25 = vadd.f32 %v693_v22, %v646_v21  ;;  %1859 = vmatprep.subr.bf16.mxu0 %v819_v17  ;;  %1907 = vmatprep.subr.bf16.mxu1 %v819_v17  ;;  %v534_v22 = vmul.f32 %v2456_v29, %v2387_v54 }
  0xfa   : > { %v698_v30 = vpop.permute.xlu0 %697  ;;  %1860 = vmatpush3.bf16.msra.mxu0 %v819_v17  ;;  %1915 = vmatpush3.bf16.msra.mxu1 %v819_v17  ;;  %v855_v17 = vld [vmem:[%s2913_s4 + $0xe0] sm:$0xff] }
  0xfb   : > { %v774_v32 = vmax.f32 %v2501_v25, 0.0  ;;  %v759_v33 = vadd.f32 %v698_v30, %v647_v26  ;;  %1489 = vadd.xlane.f32.xlu0 %v773_v23  ;;  %v857_v30 = vld [vmem:[%s2913_s4 + $0xf0] sm:$0xff]  ;;  %v540_v25 = vmul.f32 %v2456_v29, %v2413_v0 }
  0xfc   : > { %931 = vperm.xlu1 %1993, %v841_v27  }
  0xfd   : > { %v820_v34 = vpack.c.bf16 %v774_v32, %v773_v23  ;;  %v775_v35 = vmax.f32 %v759_v33, 0.0  ;;  %v485_v37 = vpop.permute.xlu1 %484  ;;  %v450_v23 = vmul.f32 %v2449_v24, %v2373_v49 }
  0xfe   : > { %v533_v42 = vmul.f32 %v2456_v29, %v485_v37  ;;  %v708_v63 = vpop.permute.xlu0 %707 }
  0xff   : > { %1493 = vadd.xlane.f32.xlu0 %v775_v35  ;;  %1861 = vmatprep.subr.bf16.mxu0 %v820_v34 }
 0x100   : > { %1908 = vmatprep.subr.bf16.mxu1 %v820_v34  ;;  %941 = vperm.xlu1 %1993, %v843_v38   ;;  %v549_v48 = vadd.f32 %v533_v42, %v449_v41 }
 0x101   : > { %1862 = vmatpush3.bf16.msra.mxu0 %v820_v34  ;;  %1916 = vmatpush3.bf16.msra.mxu1 %v820_v34 }
 0x102   : > { %v585_v47 = vpop.permute.xlu1 %584  ;;  %v718_v10 = vpop.permute.xlu0 %717 }
 0x103   : > { %v633_v53 = vmul.f32 %v2459_v31, %v585_v47 }
 0x104   : > { %951 = vperm.xlu1 %1993, %v845_v45  }
 0x105   : > { %v649_v16 = vadd.f32 %v633_v53, %v549_v48 }
 0x106   : > { %v589_v2 = vpop.permute.xlu1 %588  ;;  %v728_v18 = vpop.permute.xlu0 %727 }
 0x107   : > { %v761_v39 = vadd.f32 %v708_v63, %v649_v16  ;;  %v634_v26 = vmul.f32 %v2459_v31, %v589_v2  ;;  %v452_v2 = vmul.f32 %v2449_v24, %v2381_v52 }
 0x108   : > { %961 = vperm.xlu1 %1993, %v847_v58  }
 0x109   : > { %v777_v7 = vmax.f32 %v761_v39, 0.0 }
 0x10a   : > { %v738_v33 = vpop.permute.xlu0 %737 }
 0x10b   : > { %v703_v9 = vpop.permute.xlu1 %702  ;;  %1497 = vadd.xlane.f32.xlu0 %v777_v7 }
 0x10c   : > { %v2530_v44 = vadd.f32 %v703_v9, %v648_v8  ;;  %971 = vperm.xlu1 %1993, %v849_v51   ;;  %v552_v8 = vadd.f32 %v536_v60, %v452_v2 }
 0x10e   : > { %v776_v11 = vmax.f32 %v2530_v44, 0.0  ;;  %v2558_v42 = vpop.permute.xlu0 %752  ;;  %v456_v44 = vmul.f32 %v2449_v24, %v2400_v59 }
 0x110   : > { %v821_v3 = vpack.c.bf16 %v776_v11, %v775_v35  ;;  %981 = vperm.xlu1 %1993, %v851_v46   ;;  %v493_v14 = vpop.permute.xlu1 %492  ;;  %v550_v35 = vadd.f32 %v534_v22, %v450_v23 }
 0x111   : > { %v535_v43 = vmul.f32 %v2456_v29, %v493_v14 }
 0x112   : > { %1863 = vmatprep.subr.bf16.mxu0 %v821_v3  ;;  %1909 = vmatprep.subr.bf16.mxu1 %v821_v3  ;;  %v650_v38 = vadd.f32 %v634_v26, %v550_v35  ;;  %v2562_v53 = vpop.permute.xlu0 %866 }
 0x113   : > { %1864 = vmatpush3.bf16.msra.mxu0 %v821_v3  ;;  %1917 = vmatpush3.bf16.msra.mxu1 %v821_v3  ;;  %v551_v19 = vadd.f32 %v535_v43, %v451_v4  ;;  %v455_v43 = vmul.f32 %v2449_v24, %v2468_v36 }
 0x114   : > { %991 = vperm.xlu1 %1993, %v853_v13  }
 0x115   : > { %v593_v12 = vpop.permute.xlu1 %592 }
 0x116   : > { %v635_v21 = vmul.f32 %v2459_v31, %v593_v12  ;;  %v2571_v39 = vpop.permute.xlu0 %876 }
 0x118   : > { %v651_v20 = vadd.f32 %v635_v21, %v551_v19  ;;  %1001 = vperm.xlu1 %1993, %v855_v17   ;;  %v538_v19 = vmul.f32 %v2456_v29, %v2406_v61 }
 0x119   : > { %v597_v27 = vpop.permute.xlu1 %596 }
 0x11a   : > { %v763_v34 = vadd.f32 %v718_v10, %v651_v20  ;;  %v636_v6 = vmul.f32 %v2459_v31, %v597_v27  ;;  %v2574_v10 = vpop.permute.xlu0 %886  ;;  %v454_v20 = vmul.f32 %v2449_v24, %v2389_v55 }
 0x11c   : > { %1011 = vperm.xlu1 %1993, %v857_v30   ;;  %v779_v37 = vmax.f32 %v763_v34, 0.0  ;;  %v652_v28 = vadd.f32 %v636_v6, %v552_v8  ;;  %v554_v27 = vadd.f32 %v538_v19, %v454_v20  ;;  %v2005_v19 = vld [vmem:[%s2912_s3 + $0x68] sm:$0xff]   ;;  %v2007_v20 = vld [vmem:[%s2912_s3 + $0x70] sm:$0xff]  }
 0x11e   : > { %v713_v41 = vpop.permute.xlu1 %712  ;;  %1501 = vadd.xlane.f32.xlu0 %v779_v37  ;;  %v2576_v4 = vpop.permute.xlu0 %896 }
 0x11f   : > { %v2556_v54 = vadd.f32 %v713_v41, %v650_v38 }
 0x121   : > { %v778_v49 = vmax.f32 %v2556_v54, 0.0 }
 0x122   : > { %v2584_v21 = vpop.permute.xlu0 %906 }
 0x123   : > { %v822_v45 = vpack.c.bf16 %v778_v49, %v777_v7  ;;  %v501_v47 = vpop.permute.xlu1 %500 }
 0x124   : > { %v537_v48 = vmul.f32 %v2456_v29, %v501_v47  ;;  %v556_v47 = vadd.f32 %v540_v25, %v456_v44 }
 0x125   : > { %1865 = vmatprep.subr.bf16.mxu0 %v822_v45  ;;  %1910 = vmatprep.subr.bf16.mxu1 %v822_v45 }
 0x126   : > { %1866 = vmatpush3.bf16.msra.mxu0 %v822_v45  ;;  %1918 = vmatpush3.bf16.msra.mxu1 %v822_v45  ;;  %v553_v58 = vadd.f32 %v537_v48, %v453_v56  ;;  %v2591_v35 = vpop.permute.xlu0 %916 }
 0x128   : > { %v601_v16 = vpop.permute.xlu1 %600 }
 0x129   : > { %v637_v40 = vmul.f32 %v2459_v31, %v601_v16 }
 0x12a   : > { %v2597_v1 = vpop.permute.xlu0 %926 }
 0x12b   : > { %v653_v63 = vadd.f32 %v637_v40, %v553_v58 }
 0x12c   : > { %v605_v7 = vpop.permute.xlu1 %604 }
 0x12d   : > { %v765_v51 = vadd.f32 %v728_v18, %v653_v63  ;;  %v638_v23 = vmul.f32 %v2459_v31, %v605_v7 }
 0x12f   : > { %v781_v9 = vmax.f32 %v765_v51, 0.0  ;;  %v654_v34 = vadd.f32 %v638_v23, %v554_v27  ;;  %v2008_v27 = vld [vmem:[%s2912_s3 + $0x38] sm:$0xff]  }
 0x131   : > { %v723_v46 = vpop.permute.xlu1 %722  ;;  %1505 = vadd.xlane.f32.xlu0 %v781_v9 }
 0x132   : > { %v764_v3 = vadd.f32 %v723_v46, %v652_v28  ;;  %v1997_v28 = vld [vmem:[%s2912_s3 + $0x48] sm:$0xff]   ;;  %v1998_v46 = vld [vmem:[%s2912_s3 + $0x10] sm:$0xff]  }
 0x134   : > { %v780_v14 = vmax.f32 %v764_v3, 0.0  ;;  %v1999_v3 = vld [vmem:[%s2912_s3 + $0x50] sm:$0xff]  }
 0x136   : > { %v823_v57 = vpack.c.bf16 %v780_v14, %v779_v37  ;;  %v509_v13 = vpop.permute.xlu1 %508 }
 0x137   : > { %v539_v52 = vmul.f32 %v2456_v29, %v509_v13  ;;  %v2001_v13 = vld [vmem:[%s2912_s3 + $0x58] sm:$0xff]  }
 0x138   : > { %1867 = vmatprep.subr.bf16.mxu0 %v823_v57  ;;  %1911 = vmatprep.subr.bf16.mxu1 %v823_v57 }
 0x139   : > { %1868 = vmatpush3.bf16.msra.mxu0 %v823_v57  ;;  %1919 = vmatpush3.bf16.msra.mxu1 %v823_v57  ;;  %v555_v12 = vadd.f32 %v539_v52, %v455_v43  ;;  %v2000_v57 = vld [vmem:[%s2912_s3 + $0x18] sm:$0xff]   ;;  %v2002_v52 = vld [vmem:[%s2912_s3 + $0x20] sm:$0xff]  }
 0x13a   : > { %v2003_v43 = vld [vmem:[%s2912_s3 + $0x60] sm:$0xff]  }
 0x13b   : > { %v609_v18 = vpop.permute.xlu1 %608 }
 0x13c   : > { %v639_v17 = vmul.f32 %v2459_v31, %v609_v18 }
 0x13e   : > { %v655_v22 = vadd.f32 %v639_v17, %v555_v12  ;;  %v2004_v17 = vld [vmem:[%s2912_s3 + $0x28] sm:$0xff]  }
 0x13f   : > { %v613_v26 = vpop.permute.xlu1 %612 }
 0x140   : > { %1487 = vadd.xlane.f32.xlu1 %v772_v15  ;;  %v767_v36 = vadd.f32 %v738_v33, %v655_v22  ;;  %v2603_v33 = vpop.permute.xlu0 %936  ;;  %v640_v54 = vmul.f32 %v2459_v31, %v613_v26  ;;  %v2006_v22 = vld [vmem:[%s2912_s3 + $0x30] sm:$0xff]  }
 0x142   : > { %v783_v30 = vmax.f32 %v767_v36, 0.0  ;;  %v656_v58 = vadd.f32 %v640_v54, %v556_v47 }
 0x144   : > { %v733_v37 = vpop.permute.xlu1 %732  ;;  %1491 = vadd.xlane.f32.xlu1 %v774_v32  ;;  %1509 = vadd.xlane.f32.xlu0 %v783_v30  ;;  %v542_v32 = vmul.f32 %v2456_v29, %v2420_v5  ;;  %v457_v5 = vmul.f32 %v2449_v24, %v2478_v50  ;;  %v2614_v56 = vpop.permute.xlu0 %946 }
 0x145   : > { %v766_v61 = vadd.f32 %v733_v37, %v654_v34 }
 0x147   : > { %v782_v38 = vmax.f32 %v766_v61, 0.0 }
 0x148   : > { %1495 = vadd.xlane.f32.xlu1 %v776_v11  ;;  %v458_v11 = vmul.f32 %v2449_v24, %v2408_v62 }
 0x149   : > { %v824_v55 = vpack.c.bf16 %v782_v38, %v781_v9  ;;  %v517_v41 = vpop.permute.xlu1 %516  ;;  %v1996_v9 = vld [vmem:[%s2912_s3 + $0x8] sm:$0xff]  }
 0x14a   : > { %v558_v48 = vadd.f32 %v542_v32, %v458_v11  ;;  %v541_v0 = vmul.f32 %v2456_v29, %v517_v41  ;;  %v2620_v29 = vpop.permute.xlu0 %956  ;;  %v1473_v11 = vld [vmem:[#allocation3 + $0x20] sm:$0xff] }
 0x14b   : > { %1869 = vmatprep.subr.bf16.mxu0 %v824_v55  ;;  %1912 = vmatprep.subr.bf16.mxu1 %v824_v55 }
 0x14c   : > { %1499 = vadd.xlane.f32.xlu1 %v778_v49  ;;  %1870 = vmatpush3.bf16.msra.mxu0 %v824_v55  ;;  %v557_v40 = vadd.f32 %v541_v0, %v457_v5 }
 0x14d   : > { %1920 = vmatpush3.bf16.msra.mxu1 %v824_v55 }
 0x14e   : > { %v617_v15 = vpop.permute.xlu1 %616 }
 0x14f   : > { %v641_v59 = vmul.f32 %v2459_v31, %v617_v15  ;;  %v1471_v15 = vld [vmem:[#allocation3 + $0x10] sm:$0xff] }
 0x150   : > { %1503 = vadd.xlane.f32.xlu1 %v780_v14 }
 0x151   : > { %v657_v6 = vadd.f32 %v641_v59, %v557_v40 }
 0x152   : > { %v621_v49 = vpop.permute.xlu1 %620 }
 0x153   : > { %v642_v45 = vmul.f32 %v2459_v31, %v621_v49 }
 0x154   : > { %1507 = vadd.xlane.f32.xlu1 %v782_v38  ;;  %v1469_v38 = vld [vmem:[#allocation3] sm:$0xff] }
 0x155   : > { %v658_v16 = vadd.f32 %v642_v45, %v558_v48  ;;  %v1475_v48 = vld [vmem:[#allocation3 + $0x30] sm:$0xff] }
 0x157   : > { %v743_v62 = vpop.permute.xlu1 %742  ;;  %v2618_v63 = vadd.f32 %v2558_v42, %v658_v16  ;;  %v2630_v42 = vpop.permute.xlu0 %966 }
 0x158   : > { %v768_v60 = vadd.f32 %v743_v62, %v656_v58  ;;  %v1477_v62 = vld [vmem:[#allocation3 + $0x40] sm:$0xff] }
 0x159   : > { %v786_v31 = vmax.f32 %v2618_v63, 0.0  ;;  %v1327_v63 = vld [vmem:[#allocation2 + $0x98] sm:$0xff] }
 0x15a   : > { %v784_v2 = vmax.f32 %v768_v60, 0.0 }
 0x15b   : > { %v748_v7 = vpop.permute.xlu1 %747  ;;  %v2644_v14 = vpop.permute.xlu0 %976 }
 0x15c   : > { %v825_v51 = vpack.c.bf16 %v784_v2, %v783_v30  ;;  %v2622_v8 = vadd.f32 %v748_v7, %v657_v6  ;;  %1511 = vadd.xlane.f32.xlu1 %v784_v2  ;;  %v2009_v30 = vld [vmem:[%s2912_s3 + $0x78] sm:$0xff]  }
 0x15e   : > { %v785_v24 = vmax.f32 %v2622_v8, 0.0  ;;  %1871 = vmatprep.subr.bf16.mxu0 %v825_v51  ;;  %1913 = vmatprep.subr.bf16.mxu1 %v825_v51 }
 0x15f   : > { %1872 = vmatpush3.bf16.msra.mxu0 %v825_v51  ;;  %1921 = vmatpush3.bf16.msra.mxu1 %v825_v51  ;;  %v2658_v18 = vpop.permute.xlu0 %986  ;;  %v2660_v12 = vpop.permute.xlu1 %861  ;;  %v1479_v51 = vld [vmem:[#allocation3 + $0x50] sm:$0xff] }
 0x160   : > { %v826_v50 = vpack.c.bf16 %v786_v31, %v785_v24 }
 0x162   : > { %1873 = vmatprep.subr.bf16.mxu0 %v826_v50  ;;  %1914 = vmatprep.subr.bf16.mxu1 %v826_v50 }
 0x163   : > { %1874 = vmatpush3.bf16.msra.mxu0 %v826_v50  ;;  %1922 = vmatpush3.bf16.msra.mxu1 %v826_v50  ;;  %v2674_v23 = vpop.permute.xlu0 %996  ;;  %v2676_v26 = vpop.permute.xlu1 %871 }
 0x166   : > { %1876 = vmatmul.mubr.bf16.vlgmr.msra.gmra.mrb[0].mxu0 %v1996_v9  ;;  %1892 = vmatmul.mubr.bf16.vlgmr.msra.gmra.mrb[0].mxu1 %v1997_v28 }
 0x167   : > { %1879 = vmatprep.mubr.bf16.mxu0 %v1998_v46  ;;  %1895 = vmatprep.mubr.bf16.mxu1 %v1999_v3  ;;  %v2678_v36 = vpop.permute.xlu0 %1006  ;;  %v2686_v34 = vpop.permute.xlu1 %881 }
 0x16b   : > { %v2688_v37 = vpop.permute.xlu0 %1016  ;;  %v2690_v61 = vpop.permute.xlu1 %891 }
 0x16e   : > { %1880 = vmatmul.mubr.bf16.gmra.mrb[4].mxu0 %v2000_v57  ;;  %1896 = vmatmul.mubr.bf16.gmra.mrb[4].mxu1 %v2001_v13  ;;  %v1470_v57 = vld [vmem:[#allocation3 + $0x8] sm:$0xff] }
 0x16f   : > { %1883 = vmatprep.mubr.bf16.mxu0 %v2002_v52  ;;  %1899 = vmatprep.mubr.bf16.mxu1 %v2003_v43  ;;  %v2692_v25 = vpop.permute.xlu1 %901  ;;  %v1472_v43 = vld [vmem:[#allocation3 + $0x18] sm:$0xff] }
 0x173   : > { %v2696_v49 = vpop.permute.xlu1 %911 }
 0x176   : > { %1884 = vmatmul.mubr.bf16.gmra.mrb[8].mxu0 %v2004_v17  ;;  %1900 = vmatmul.mubr.bf16.gmra.mrb[8].mxu1 %v2005_v19  ;;  %v1481_v17 = vld [vmem:[#allocation3 + $0x60] sm:$0xff] }
 0x177   : > { %1887 = vmatprep.mubr.bf16.mxu0 %v2006_v22  ;;  %1903 = vmatprep.mubr.bf16.mxu1 %v2007_v20  ;;  %v2699_v47 = vpop.permute.xlu1 %921 }
 0x17b   : > { %v2701_v5 = vpop.permute.xlu1 %931 }
 0x17e   : > { %1888 = vmatmul.mubr.bf16.gmra.mrb[12].mxu0 %v2008_v27  ;;  %1904 = vmatmul.mubr.bf16.gmra.mrb[12].mxu1 %v2009_v30  ;;  %v1474_v30 = vld [vmem:[#allocation3 + $0x28] sm:$0xff] }
 0x17f   : > { %v2704_v16 = vpop.permute.xlu1 %941 }
 0x183   : > { %v952_v58 = vpop.permute.xlu1 %951 }
 0x184   : > { %v1486_v55 = vpop.xlane.xlu0 %1485 }
 0x185   : > { %v1517_v41 = vadd.f32 %v1486_v55, %v1469_v38 }
 0x187   : > { %1533 = vst.msk [vmem:[#allocation3] sm:$0xff] %vm1436_vm1, %v1517_v41  ;;  %v2706_v40 = vpop.permute.xlu1 %961  ;;  %v1476_v41 = vld [vmem:[#allocation3 + $0x38] sm:$0xff] }
 0x188   : > { %v1490_v32 = vpop.xlane.xlu0 %1489 }
 0x189   : > { %v1519_v44 = vadd.f32 %v1490_v32, %v1471_v15 }
 0x18b   : > { %1535 = vst.msk [vmem:[#allocation3 + $0x10] sm:$0xff] %vm1436_vm1, %v1519_v44  ;;  %v2709_v6 = vpop.permute.xlu1 %971  ;;  %v1478_v44 = vld [vmem:[#allocation3 + $0x48] sm:$0xff] }
 0x18c   : > { %v1494_v54 = vpop.xlane.xlu0 %1493 }
 0x18d   : > { %v1521_v45 = vadd.f32 %v1494_v54, %v1473_v11 }
 0x18f   : > { %1537 = vst.msk [vmem:[#allocation3 + $0x20] sm:$0xff] %vm1436_vm1, %v1521_v45  ;;  %v2711_v7 = vpop.permute.xlu1 %981  ;;  %v1480_v45 = vld [vmem:[#allocation3 + $0x58] sm:$0xff] }
 0x193   : > { %v2713_v50 = vpop.permute.xlu1 %991 }
 0x197   : > { %v2716_v46 = vpop.permute.xlu1 %1001 }
 0x198   : > { %v1498_v0 = vpop.xlane.xlu0 %1497 }
 0x199   : > { %v1523_v59 = vadd.f32 %v1498_v0, %v1475_v48 }
 0x19b   : > { %1539 = vst.msk [vmem:[#allocation3 + $0x30] sm:$0xff] %vm1436_vm1, %v1523_v59  ;;  %v2718_v3 = vpop.permute.xlu1 %1011  ;;  %v1482_v59 = vld [vmem:[#allocation3 + $0x68] sm:$0xff] }
 0x1ab   : > { %v1502_v60 = vpop.xlane.xlu0 %1501 }
 0x1ac   : > { %v1525_v2 = vadd.f32 %v1502_v60, %v1477_v62 }
 0x1ae   : > { %1541 = vst.msk [vmem:[#allocation3 + $0x40] sm:$0xff] %vm1436_vm1, %v1525_v2 }
 0x1be   : > { %v1506_v9 = vpop.xlane.xlu0 %1505 }
 0x1bf   : > { %v1527_v28 = vadd.f32 %v1506_v9, %v1479_v51 }
 0x1c1   : > { %1543 = vst.msk [vmem:[#allocation3 + $0x50] sm:$0xff] %vm1436_vm1, %v1527_v28 }
 0x1cd   : > { %v1488_v13 = vpop.xlane.xlu1 %1487 }
 0x1ce   : > { %v1518_v52 = vadd.f32 %v1488_v13, %v1470_v57 }
 0x1d0   : > { %1534 = vst.msk [vmem:[#allocation3 + $0x8] sm:$0xff] %vm1436_vm1, %v1518_v52 }
 0x1d1   : > { %v1492_v19 = vpop.xlane.xlu1 %1491  ;;  %v1510_v22 = vpop.xlane.xlu0 %1509 }
 0x1d2   : > { %v1520_v20 = vadd.f32 %v1492_v19, %v1472_v43  ;;  %v1529_v27 = vadd.f32 %v1510_v22, %v1481_v17 }
 0x1d4   : > { %1536 = vst.msk [vmem:[#allocation3 + $0x18] sm:$0xff] %vm1436_vm1, %v1520_v20  ;;  %1545 = vst.msk [vmem:[#allocation3 + $0x60] sm:$0xff] %vm1436_vm1, %v1529_v27 }
 0x1d5   : > { %v1496_v38 = vpop.xlane.xlu1 %1495 }
 0x1d6   : > { %v1522_v55 = vadd.f32 %v1496_v38, %v1474_v30 }
 0x1d8   : > { %1538 = vst.msk [vmem:[#allocation3 + $0x28] sm:$0xff] %vm1436_vm1, %v1522_v55 }
 0x1d9   : > { %v1500_v15 = vpop.xlane.xlu1 %1499 }
 0x1da   : > { %v1524_v32 = vadd.f32 %v1500_v15, %v1476_v41 }
 0x1dc   : > { %1540 = vst.msk [vmem:[#allocation3 + $0x38] sm:$0xff] %vm1436_vm1, %v1524_v32 }
 0x1dd   : > { %v1504_v11 = vpop.xlane.xlu1 %1503 }
 0x1de   : > { %v1526_v54 = vadd.f32 %v1504_v11, %v1478_v44 }
 0x1e0   : > { %1542 = vst.msk [vmem:[#allocation3 + $0x48] sm:$0xff] %vm1436_vm1, %v1526_v54 }
 0x1e1   : > { %v1508_v48 = vpop.xlane.xlu1 %1507 }
 0x1e2   : > { %v1528_v0 = vadd.f32 %v1508_v48, %v1480_v45 }
 0x1e4   : > { %1544 = vst.msk [vmem:[#allocation3 + $0x58] sm:$0xff] %vm1436_vm1, %v1528_v0 }
 0x1e9   : > { %v1512_v62 = vpop.xlane.xlu1 %1511 }
 0x1ea   : > { %v1530_v60 = vadd.f32 %v1512_v62, %v1482_v59 }
 0x1ec   : > { %1546 = vst.msk [vmem:[#allocation3 + $0x68] sm:$0xff] %vm1436_vm1, %v1530_v60 }
 0x239   : > { %v1877_v2 = vpop.f32.mrb[0].mxu0  ;;  %v1893_v51 = vpop.f32.mrb[0].mxu1 }
 0x23a   : > { %v1158_v9 = vadd.f32 %v1877_v2, %v2676_v26  ;;  %v1149_v28 = vpop.f32.mrb[1].mxu0  ;;  %v1213_v57 = vpop.f32.mrb[1].mxu1  ;;  %v1222_v19 = vadd.f32 %v1893_v51, %v952_v58 }
 0x23b   : > { %v1150_v13 = vadd.f32 %v1149_v28, %v2660_v12  ;;  %v1878_v52 = vpop.f32.mrb[2].mxu0  ;;  %v1894_v43 = vpop.f32.mrb[2].mxu1  ;;  %v1214_v55 = vadd.f32 %v1213_v57, %v2704_v16 }
 0x23c   : > { %v1278_v17 = vmax.f32 %v1158_v9, 0.0  ;;  %v1152_v22 = vpop.f32.mrb[3].mxu0  ;;  %v1216_v20 = vpop.f32.mrb[3].mxu1  ;;  %v1161_v30 = vadd.f32 %v1878_v52, %v2571_v39  ;;  %v1294_v38 = vmax.f32 %v1222_v19, 0.0  ;;  %v1225_v26 = vadd.f32 %v1894_v43, %v2620_v29 }
 0x23d   : > { %v1276_v27 = vmax.f32 %v1150_v13, 0.0  ;;  %v1292_v54 = vmax.f32 %v1214_v55, 0.0  ;;  %v1153_v45 = vadd.f32 %v1152_v22, %v2562_v53  ;;  %v1217_v59 = vadd.f32 %v1216_v20, %v2614_v56 }
 0x23e   : > { %1344 = vadd.xlane.f32.xlu0 %v1278_v17  ;;  %v1279_v41 = vmax.f32 %v1161_v30, 0.0  ;;  %v1295_v0 = vmax.f32 %v1225_v26, 0.0 }
 0x23f   : > { %1340 = vadd.xlane.f32.xlu1 %v1276_v27  ;;  %v1277_v16 = vmax.f32 %v1153_v45, 0.0  ;;  %v1293_v62 = vmax.f32 %v1217_v59, 0.0 }
 0x241   : > { %v1881_v15 = vpop.f32.mrb[4].mxu0  ;;  %v1897_v32 = vpop.f32.mrb[4].mxu1 }
 0x242   : > { %v1229_v12 = vpop.f32.mrb[5].mxu1  ;;  %1376 = vadd.xlane.f32.xlu0 %v1294_v38  ;;  %v1165_v44 = vpop.f32.mrb[5].mxu0  ;;  %v1174_v29 = vadd.f32 %v1881_v15, %v2690_v61  ;;  %v1238_v52 = vadd.f32 %v1897_v32, %v2709_v6 }
 0x243   : > { %v1882_v11 = vpop.f32.mrb[6].mxu0  ;;  %v1898_v58 = vpop.f32.mrb[6].mxu1  ;;  %1346 = vadd.xlane.f32.xlu1 %v1279_v41  ;;  %v1230_v26 = vadd.f32 %v1229_v12, %v2706_v40 }
 0x244   : > { %v1168_v39 = vpop.f32.mrb[7].mxu0  ;;  %v1232_v48 = vpop.f32.mrb[7].mxu1  ;;  %v1177_v60 = vadd.f32 %v1882_v11, %v2576_v4  ;;  %v1282_v13 = vmax.f32 %v1174_v29, 0.0  ;;  %v1241_v19 = vadd.f32 %v1898_v58, %v2644_v14  ;;  %v1298_v61 = vmax.f32 %v1238_v52, 0.0 }
 0x245   : > { %v1166_v4 = vadd.f32 %v1165_v44, %v2686_v34  ;;  %v1169_v20 = vadd.f32 %v1168_v39, %v2574_v10  ;;  %v1233_v58 = vadd.f32 %v1232_v48, %v2630_v42  ;;  %v1296_v34 = vmax.f32 %v1230_v26, 0.0  ;;  %v1314_v26 = vld [vmem:[#allocation2 + $0x30] sm:$0xff] }
 0x246   : > { %1372 = vadd.xlane.f32.xlu0 %v1292_v54  ;;  %v1283_v17 = vmax.f32 %v1177_v60, 0.0  ;;  %v1299_v22 = vmax.f32 %v1241_v19, 0.0 }
 0x247   : > { %1378 = vadd.xlane.f32.xlu1 %v1295_v0  ;;  %v1280_v15 = vmax.f32 %v1166_v4, 0.0  ;;  %v1281_v11 = vmax.f32 %v1169_v20, 0.0  ;;  %v1297_v44 = vmax.f32 %v1233_v58, 0.0 }
 0x249   : > { %v1885_v2 = vpop.f32.mrb[8].mxu0  ;;  %v1901_v51 = vpop.f32.mrb[8].mxu1 }
 0x24a   : > { %v1181_v9 = vpop.f32.mrb[9].mxu0  ;;  %v1245_v28 = vpop.f32.mrb[9].mxu1  ;;  %1342 = vadd.xlane.f32.xlu0 %v1277_v16  ;;  %v1190_v10 = vadd.f32 %v1885_v2, %v2696_v49  ;;  %v1254_v39 = vadd.f32 %v1901_v51, %v2713_v50 }
 0x24b   : > { %v1886_v57 = vpop.f32.mrb[10].mxu0  ;;  %v1902_v53 = vpop.f32.mrb[10].mxu1  ;;  %1374 = vadd.xlane.f32.xlu1 %v1293_v62  ;;  %v1182_v42 = vadd.f32 %v1181_v9, %v2692_v25 }
 0x24c   : > { %v1184_v56 = vpop.f32.mrb[11].mxu0  ;;  %v1248_v43 = vpop.f32.mrb[11].mxu1  ;;  %v1193_v54 = vadd.f32 %v1886_v57, %v2591_v35  ;;  %v1286_v45 = vmax.f32 %v1190_v10, 0.0  ;;  %v1257_v12 = vadd.f32 %v1902_v53, %v2674_v23  ;;  %v1302_v0 = vmax.f32 %v1254_v39, 0.0  ;;  %v1331_v10 = vld [vmem:[#allocation2 + $0xb8] sm:$0xff] }
 0x24d   : > { %v1185_v59 = vadd.f32 %v1184_v56, %v2584_v21  ;;  %v1284_v49 = vmax.f32 %v1182_v42, 0.0  ;;  %v1246_v35 = vadd.f32 %v1245_v28, %v2711_v7  ;;  %v1249_v29 = vadd.f32 %v1248_v43, %v2658_v18  ;;  %v1326_v43 = vld [vmem:[#allocation2 + $0x90] sm:$0xff] }
 0x24e   : > { %1352 = vadd.xlane.f32.xlu0 %v1282_v13  ;;  %v1287_v40 = vmax.f32 %v1193_v54, 0.0  ;;  %v1303_v48 = vmax.f32 %v1257_v12, 0.0  ;;  %v1313_v12 = vld [vmem:[#allocation2 + $0x28] sm:$0xff] }
 0x24f   : > { %1354 = vadd.xlane.f32.xlu1 %v1283_v17  ;;  %v1285_v16 = vmax.f32 %v1185_v59, 0.0  ;;  %v1300_v50 = vmax.f32 %v1246_v35, 0.0  ;;  %v1301_v62 = vmax.f32 %v1249_v29, 0.0  ;;  %v1329_v35 = vld [vmem:[#allocation2 + $0xa8] sm:$0xff] }
 0x251   : > { %v1889_v27 = vpop.f32.mrb[12].mxu0  ;;  %v1905_v30 = vpop.f32.mrb[12].mxu1 }
 0x252   : > { %v1197_v38 = vpop.f32.mrb[13].mxu0  ;;  %v1261_v55 = vpop.f32.mrb[13].mxu1  ;;  %1384 = vadd.xlane.f32.xlu0 %v1298_v61  ;;  %v1206_v23 = vadd.f32 %v1889_v27, %v2701_v5  ;;  %v1270_v21 = vadd.f32 %v1905_v30, %v2718_v3  ;;  %v1309_v27 = vld [vmem:[#allocation2 + $0x8] sm:$0xff] }
 0x253   : > { %v1890_v41 = vpop.f32.mrb[14].mxu0  ;;  %v1906_v6 = vpop.f32.mrb[14].mxu1  ;;  %1386 = vadd.xlane.f32.xlu1 %v1299_v22  ;;  %v1198_v18 = vadd.f32 %v1197_v38, %v2699_v47  ;;  %v1308_v47 = vld [vmem:[#allocation2] sm:$0xff]  ;;  %v1325_v30 = vld [vmem:[#allocation2 + $0x88] sm:$0xff] }
 0x254   : > { %v1200_v14 = vpop.f32.mrb[15].mxu0  ;;  %v1264_v32 = vpop.f32.mrb[15].mxu1  ;;  %v1209_v60 = vadd.f32 %v1890_v41, %v2603_v33  ;;  %v1290_v25 = vmax.f32 %v1206_v23, 0.0  ;;  %v1273_v51 = vadd.f32 %v1906_v6, %v2688_v37  ;;  %v1306_v7 = vmax.f32 %v1270_v21, 0.0 }
 0x255   : > { %v1201_v28 = vadd.f32 %v1200_v14, %v2597_v1  ;;  %v1288_v5 = vmax.f32 %v1198_v18, 0.0  ;;  %v1262_v33 = vadd.f32 %v1261_v55, %v2716_v46  ;;  %v1265_v53 = vadd.f32 %v1264_v32, %v2678_v36  ;;  %v1310_v1 = vld [vmem:[#allocation2 + $0x10] sm:$0xff]  ;;  %v1311_v36 = vld [vmem:[#allocation2 + $0x18] sm:$0xff] }
 0x256   : > { %1348 = vadd.xlane.f32.xlu0 %v1280_v15  ;;  %v1291_v2 = vmax.f32 %v1209_v60, 0.0  ;;  %v1307_v9 = vmax.f32 %v1273_v51, 0.0  ;;  %v1315_v15 = vld [vmem:[#allocation2 + $0x38] sm:$0xff] }
 0x257   : > { %1350 = vadd.xlane.f32.xlu1 %v1281_v11  ;;  %v1289_v57 = vmax.f32 %v1201_v28, 0.0  ;;  %v1304_v3 = vmax.f32 %v1262_v33, 0.0  ;;  %v1305_v37 = vmax.f32 %v1265_v53, 0.0  ;;  %v1319_v60 = vld [vmem:[#allocation2 + $0x58] sm:$0xff]  ;;  %v1317_v53 = vld [vmem:[#allocation2 + $0x48] sm:$0xff] }
 0x258   : > { %v1335_v18 = vld [vmem:[#allocation2 + $0xd8] sm:$0xff] }
 0x25a   : > { %1380 = vadd.xlane.f32.xlu0 %v1296_v34  ;;  %v1330_v34 = vld [vmem:[#allocation2 + $0xb0] sm:$0xff] }
 0x25b   : > { %1382 = vadd.xlane.f32.xlu1 %v1297_v44 }
 0x25e   : > { %1360 = vadd.xlane.f32.xlu0 %v1286_v45 }
 0x25f   : > { %1362 = vadd.xlane.f32.xlu1 %v1287_v40  ;;  %v1312_v40 = vld [vmem:[#allocation2 + $0x20] sm:$0xff] }
 0x262   : > { %1392 = vadd.xlane.f32.xlu0 %v1302_v0 }
 0x263   : > { %1394 = vadd.xlane.f32.xlu1 %v1303_v48 }
 0x266   : > { %1356 = vadd.xlane.f32.xlu0 %v1284_v49  ;;  %v1328_v49 = vld [vmem:[#allocation2 + $0xa0] sm:$0xff] }
 0x267   : > { %1358 = vadd.xlane.f32.xlu1 %v1285_v16 }
 0x26a   : > { %1388 = vadd.xlane.f32.xlu0 %v1300_v50 }
 0x26b   : > { %1390 = vadd.xlane.f32.xlu1 %v1301_v62  ;;  %v1318_v62 = vld [vmem:[#allocation2 + $0x50] sm:$0xff] }
 0x26e   : > { %1368 = vadd.xlane.f32.xlu0 %v1290_v25 }
 0x26f   : > { %1370 = vadd.xlane.f32.xlu1 %v1291_v2 }
 0x272   : > { %1400 = vadd.xlane.f32.xlu0 %v1306_v7  ;;  %v1334_v7 = vld [vmem:[#allocation2 + $0xd0] sm:$0xff] }
 0x273   : > { %1402 = vadd.xlane.f32.xlu1 %v1307_v9 }
 0x276   : > { %1364 = vadd.xlane.f32.xlu0 %v1288_v5 }
 0x277   : > { %1366 = vadd.xlane.f32.xlu1 %v1289_v57  ;;  %v1316_v57 = vld [vmem:[#allocation2 + $0x40] sm:$0xff] }
 0x27a   : > { %1396 = vadd.xlane.f32.xlu0 %v1304_v3 }
 0x27b   : > { %1398 = vadd.xlane.f32.xlu1 %v1305_v37 }
 0x27e   : > { %1513 = vadd.xlane.f32.xlu0 %v785_v24  ;;  %v1324_v24 = vld [vmem:[#allocation2 + $0x80] sm:$0xff] }
 0x27f   : > { %1515 = vadd.xlane.f32.xlu1 %v786_v31 }
 0x2cb   : > { %v1345_v13 = vpop.xlane.xlu0 %1344 }
 0x2cc   : > { %v1406_v52 = vadd.f32 %v1345_v13, %v1310_v1  ;;  %v1341_v46 = vpop.xlane.xlu1 %1340  ;;  %v1332_v13 = vld [vmem:[#allocation2 + $0xc0] sm:$0xff] }
 0x2cd   : > { %v1404_v56 = vadd.f32 %v1341_v46, %v1308_v47 }
 0x2ce   : > { %1439 = vst.msk [vmem:[#allocation2 + $0x10] sm:$0xff] %vm1436_vm1, %v1406_v52  ;;  %v1333_v52 = vld [vmem:[#allocation2 + $0xc8] sm:$0xff] }
 0x2cf   : > { %1437 = vst.msk [vmem:[#allocation2] sm:$0xff] %vm1436_vm1, %v1404_v56  ;;  %v1377_v17 = vpop.xlane.xlu0 %1376 }
 0x2d0   : > { %v1422_v19 = vadd.f32 %v1377_v17, %v1326_v43  ;;  %v1347_v61 = vpop.xlane.xlu1 %1346  ;;  %v1322_v17 = vld [vmem:[#allocation2 + $0x70] sm:$0xff] }
 0x2d1   : > { %v1407_v8 = vadd.f32 %v1347_v61, %v1311_v36 }
 0x2d2   : > { %1455 = vst.msk [vmem:[#allocation2 + $0x90] sm:$0xff] %vm1436_vm1, %v1422_v19  ;;  %v1323_v19 = vld [vmem:[#allocation2 + $0x78] sm:$0xff] }
 0x2d3   : > { %1440 = vst.msk [vmem:[#allocation2 + $0x18] sm:$0xff] %vm1436_vm1, %v1407_v8  ;;  %v1373_v31 = vpop.xlane.xlu0 %1372 }
 0x2d4   : > { %v1420_v4 = vadd.f32 %v1373_v31, %v1324_v24  ;;  %v1379_v22 = vpop.xlane.xlu1 %1378  ;;  %v1338_v31 = vld [vmem:[#allocation2 + $0xf0] sm:$0xff] }
 0x2d5   : > { %v1423_v20 = vadd.f32 %v1379_v22, %v1327_v63 }
 0x2d6   : > { %1453 = vst.msk [vmem:[#allocation2 + $0x80] sm:$0xff] %vm1436_vm1, %v1420_v4  ;;  %v1339_v4 = vld [vmem:[#allocation2 + $0xf8] sm:$0xff] }
 0x2d7   : > { %1456 = vst.msk [vmem:[#allocation2 + $0x98] sm:$0xff] %vm1436_vm1, %v1423_v20  ;;  %v1343_v38 = vpop.xlane.xlu0 %1342 }
 0x2d8   : > { %v1405_v55 = vadd.f32 %v1343_v38, %v1309_v27  ;;  %v1375_v41 = vpop.xlane.xlu1 %1374  ;;  %v1320_v38 = vld [vmem:[#allocation2 + $0x60] sm:$0xff] }
 0x2d9   : > { %v1421_v6 = vadd.f32 %v1375_v41, %v1325_v30 }
 0x2da   : > { %1438 = vst.msk [vmem:[#allocation2 + $0x8] sm:$0xff] %vm1436_vm1, %v1405_v55  ;;  %v1321_v55 = vld [vmem:[#allocation2 + $0x68] sm:$0xff] }
 0x2db   : > { %1454 = vst.msk [vmem:[#allocation2 + $0x88] sm:$0xff] %vm1436_vm1, %v1421_v6  ;;  %v1353_v14 = vpop.xlane.xlu0 %1352 }
 0x2dc   : > { %v1410_v32 = vadd.f32 %v1353_v14, %v1314_v26  ;;  %v1355_v11 = vpop.xlane.xlu1 %1354  ;;  %v1336_v14 = vld [vmem:[#allocation2 + $0xe0] sm:$0xff] }
 0x2dd   : > { %v1411_v58 = vadd.f32 %v1355_v11, %v1315_v15 }
 0x2de   : > { %1443 = vst.msk [vmem:[#allocation2 + $0x30] sm:$0xff] %vm1436_vm1, %v1410_v32  ;;  %v1337_v32 = vld [vmem:[#allocation2 + $0xe8] sm:$0xff] }
 0x2df   : > { %1444 = vst.msk [vmem:[#allocation2 + $0x38] sm:$0xff] %vm1436_vm1, %v1411_v58  ;;  %v1385_v44 = vpop.xlane.xlu0 %1384 }
 0x2e0   : > { %v1426_v54 = vadd.f32 %v1385_v44, %v1330_v34  ;;  %v1387_v45 = vpop.xlane.xlu1 %1386  ;;  %v1483_v44 = vld [vmem:[#allocation3 + $0x70] sm:$0xff] }
 0x2e1   : > { %v1427_v39 = vadd.f32 %v1387_v45, %v1331_v10 }
 0x2e2   : > { %1459 = vst.msk [vmem:[#allocation2 + $0xb0] sm:$0xff] %vm1436_vm1, %v1426_v54  ;;  %v1484_v54 = vld [vmem:[#allocation3 + $0x78] sm:$0xff] }
 0x2e3   : > { %1460 = vst.msk [vmem:[#allocation2 + $0xb8] sm:$0xff] %vm1436_vm1, %v1427_v39  ;;  %v1349_v0 = vpop.xlane.xlu0 %1348 }
 0x2e4   : > { %v1408_v42 = vadd.f32 %v1349_v0, %v1312_v40  ;;  %v1351_v48 = vpop.xlane.xlu1 %1350  ;;  %v1553_v0 = vld [vmem:[#allocation2] sm:$0xff] (!%p1830_p8) }
 0x2e5   : > { %v1409_v59 = vadd.f32 %v1351_v48, %v1313_v12  ;;  %v1555_v48 = vld [vmem:[#allocation2 + $0x10] sm:$0xff] (!%p1830_p8) }
 0x2e6   : > { %1441 = vst.msk [vmem:[#allocation2 + $0x20] sm:$0xff] %vm1436_vm1, %v1408_v42  ;;  %v1554_v42 = vld [vmem:[#allocation2 + $0x8] sm:$0xff] (!%p1830_p8) }
 0x2e7   : > { %1442 = vst.msk [vmem:[#allocation2 + $0x28] sm:$0xff] %vm1436_vm1, %v1409_v59  ;;  %v1381_v16 = vpop.xlane.xlu0 %1380  ;;  %v1585_v59 = vmul.f32 (!%p1830_p8), 0.00390625, %v1553_v0 }
 0x2e8   : > { %v1424_v29 = vadd.f32 %v1381_v16, %v1328_v49  ;;  %v1383_v50 = vpop.xlane.xlu1 %1382  ;;  %v1586_v49 = vmul.f32 (!%p1830_p8), 0.00390625, %v1554_v42  ;;  %v1556_v16 = vld [vmem:[#allocation2 + $0x18] sm:$0xff] (!%p1830_p8) }
 0x2e9   : > { %v1425_v23 = vadd.f32 %v1383_v50, %v1329_v35  ;;  %v1587_v35 = vmul.f32 (!%p1830_p8), 0.00390625, %v1555_v48  ;;  %1617 = vst.msk [vmem:[%s2126_s10] sm:$0xff] (!%p1830_p8), %vm1436_vm1, %v1585_v59  ;;  %v1650_v48 = vld [vmem:[#allocation3 + $0x8] sm:$0xff] (!%p1830_p8)  ;;  %v1651_v59 = vld [vmem:[#allocation3 + $0x10] sm:$0xff] (!%p1830_p8) }
 0x2ea   : > { %1457 = vst.msk [vmem:[#allocation2 + $0xa0] sm:$0xff] %vm1436_vm1, %v1424_v29  ;;  %1618 = vst.msk [vmem:[%s2126_s10 + $0x8] sm:$0xff] (!%p1830_p8), %vm1436_vm1, %v1586_v49  ;;  %v1652_v49 = vld [vmem:[#allocation3 + $0x18] sm:$0xff] (!%p1830_p8) }
 0x2eb   : > { %1458 = vst.msk [vmem:[#allocation2 + $0xa8] sm:$0xff] %vm1436_vm1, %v1425_v23  ;;  %v1361_v25 = vpop.xlane.xlu0 %1360  ;;  %v1588_v23 = vmul.f32 (!%p1830_p8), 0.00390625, %v1556_v16  ;;  %1619 = vst.msk [vmem:[%s2126_s10 + $0x10] sm:$0xff] (!%p1830_p8), %vm1436_vm1, %v1587_v35  ;;  %v1666_v35 = vmul.f32 (!%p1830_p8), 0.00390625, %v1650_v48  ;;  %v1667_v16 = vmul.f32 (!%p1830_p8), 0.00390625, %v1651_v59 }
 0x2ec   : > { %v1414_v21 = vadd.f32 %v1361_v25, %v1318_v62  ;;  %v1363_v2 = vpop.xlane.xlu1 %1362  ;;  %v1559_v25 = vld [vmem:[#allocation2 + $0x30] sm:$0xff] (!%p1830_p8) }
 0x2ed   : > { %v1415_v51 = vadd.f32 %v1363_v2, %v1319_v60  ;;  %v1557_v29 = vld [vmem:[#allocation2 + $0x20] sm:$0xff] (!%p1830_p8)  ;;  %1620 = vst.msk [vmem:[%s2126_s10 + $0x18] sm:$0xff] (!%p1830_p8), %vm1436_vm1, %v1588_v23  ;;  %v1654_v23 = vld [vmem:[#allocation3 + $0x28] sm:$0xff] (!%p1830_p8)  ;;  %1682 = vst.msk [vmem:[%s2136_s18 + $0x8] sm:$0xff] (!%p1830_p8), %vm1436_vm1, %v1666_v35 }
 0x2ee   : > { %1447 = vst.msk [vmem:[#allocation2 + $0x50] sm:$0xff] %vm1436_vm1, %v1414_v21  ;;  %v1558_v50 = vld [vmem:[#allocation2 + $0x28] sm:$0xff] (!%p1830_p8)  ;;  %v1589_v62 = vmul.f32 (!%p1830_p8), 0.00390625, %v1557_v29  ;;  %v1560_v21 = vld [vmem:[#allocation2 + $0x38] sm:$0xff] (!%p1830_p8)  ;;  %v1668_v29 = vmul.f32 (!%p1830_p8), 0.00390625, %v1652_v49  ;;  %1683 = vst.msk [vmem:[%s2136_s18 + $0x10] sm:$0xff] (!%p1830_p8), %vm1436_vm1, %v1667_v16 }
 0x2ef   : > { %1448 = vst.msk [vmem:[#allocation2 + $0x58] sm:$0xff] %vm1436_vm1, %v1415_v51  ;;  %v1393_v9 = vpop.xlane.xlu0 %1392  ;;  %v1590_v60 = vmul.f32 (!%p1830_p8), 0.00390625, %v1558_v50  ;;  %v1591_v51 = vmul.f32 (!%p1830_p8), 0.00390625, %v1559_v25  ;;  %v1653_v50 = vld [vmem:[#allocation3 + $0x20] sm:$0xff] (!%p1830_p8)  ;;  %v1670_v25 = vmul.f32 (!%p1830_p8), 0.00390625, %v1654_v23 }
 0x2f0   : > { %v1430_v28 = vadd.f32 %v1393_v9, %v1334_v7  ;;  %v1395_v5 = vpop.xlane.xlu1 %1394  ;;  %v1592_v7 = vmul.f32 (!%p1830_p8), 0.00390625, %v1560_v21  ;;  %1621 = vst.msk [vmem:[%s2126_s10 + $0x20] sm:$0xff] (!%p1830_p8), %vm1436_vm1, %v1589_v62  ;;  %v1655_v62 = vld [vmem:[#allocation3 + $0x30] sm:$0xff] (!%p1830_p8)  ;;  %1684 = vst.msk [vmem:[%s2136_s18 + $0x18] sm:$0xff] (!%p1830_p8), %vm1436_vm1, %v1668_v29 }
 0x2f1   : > { %v1431_v33 = vadd.f32 %v1395_v5, %v1335_v18  ;;  %1622 = vst.msk [vmem:[%s2126_s10 + $0x28] sm:$0xff] (!%p1830_p8), %vm1436_vm1, %v1590_v60  ;;  %1623 = vst.msk [vmem:[%s2126_s10 + $0x30] sm:$0xff] (!%p1830_p8), %vm1436_vm1, %v1591_v51  ;;  %v1669_v60 = vmul.f32 (!%p1830_p8), 0.00390625, %v1653_v50  ;;  %v1671_v21 = vmul.f32 (!%p1830_p8), 0.00390625, %v1655_v62  ;;  %v1657_v51 = vld [vmem:[#allocation3 + $0x40] sm:$0xff] (!%p1830_p8) }
 0x2f2   : > { %1463 = vst.msk [vmem:[#allocation2 + $0xd0] sm:$0xff] %vm1436_vm1, %v1430_v28  ;;  %1624 = vst.msk [vmem:[%s2126_s10 + $0x38] sm:$0xff] (!%p1830_p8), %vm1436_vm1, %v1592_v7  ;;  %v1658_v7 = vld [vmem:[#allocation3 + $0x48] sm:$0xff] (!%p1830_p8) }
 0x2f3   : > { %1464 = vst.msk [vmem:[#allocation2 + $0xd8] sm:$0xff] %vm1436_vm1, %v1431_v33  ;;  %v1357_v3 = vpop.xlane.xlu0 %1356  ;;  %1685 = vst.msk [vmem:[%s2136_s18 + $0x20] sm:$0xff] (!%p1830_p8), %vm1436_vm1, %v1669_v60 }
 0x2f4   : > { %v1412_v37 = vadd.f32 %v1357_v3, %v1316_v57  ;;  %v1359_v1 = vpop.xlane.xlu1 %1358  ;;  %1686 = vst.msk [vmem:[%s2136_s18 + $0x28] sm:$0xff] (!%p1830_p8), %vm1436_vm1, %v1670_v25  ;;  %1687 = vst.msk [vmem:[%s2136_s18 + $0x30] sm:$0xff] (!%p1830_p8), %vm1436_vm1, %v1671_v21 }
 0x2f5   : > { %v1413_v47 = vadd.f32 %v1359_v1, %v1317_v53  ;;  %v1563_v28 = vld [vmem:[#allocation2 + $0x50] sm:$0xff] (!%p1830_p8) }
 0x2f6   : > { %1445 = vst.msk [vmem:[#allocation2 + $0x40] sm:$0xff] %vm1436_vm1, %v1412_v37  ;;  %v1564_v5 = vld [vmem:[#allocation2 + $0x58] sm:$0xff] (!%p1830_p8)  ;;  %v1595_v57 = vmul.f32 (!%p1830_p8), 0.00390625, %v1563_v28  ;;  %v1674_v28 = vmul.f32 (!%p1830_p8), 0.00390625, %v1658_v7 }
 0x2f7   : > { %1446 = vst.msk [vmem:[#allocation2 + $0x48] sm:$0xff] %vm1436_vm1, %v1413_v47  ;;  %v1389_v46 = vpop.xlane.xlu0 %1388  ;;  %v1596_v53 = vmul.f32 (!%p1830_p8), 0.00390625, %v1564_v5  ;;  %v1659_v5 = vld [vmem:[#allocation3 + $0x50] sm:$0xff] (!%p1830_p8) }
 0x2f8   : > { %v1428_v56 = vadd.f32 %v1389_v46, %v1332_v13  ;;  %v1391_v43 = vpop.xlane.xlu1 %1390  ;;  %1627 = vst.msk [vmem:[%s2126_s10 + $0x50] sm:$0xff] (!%p1830_p8), %vm1436_vm1, %v1595_v57  ;;  %v1661_v57 = vld [vmem:[#allocation3 + $0x60] sm:$0xff] (!%p1830_p8)  ;;  %1690 = vst.msk [vmem:[%s2136_s18 + $0x48] sm:$0xff] (!%p1830_p8), %vm1436_vm1, %v1674_v28 }
 0x2f9   : > { %v1429_v36 = vadd.f32 %v1391_v43, %v1333_v52  ;;  %v1570_v43 = vld [vmem:[#allocation2 + $0x88] sm:$0xff] (!%p1830_p8)  ;;  %1628 = vst.msk [vmem:[%s2126_s10 + $0x58] sm:$0xff] (!%p1830_p8), %vm1436_vm1, %v1596_v53  ;;  %v1675_v53 = vmul.f32 (!%p1830_p8), 0.00390625, %v1659_v5 }
 0x2fa   : > { %1461 = vst.msk [vmem:[#allocation2 + $0xc0] sm:$0xff] %vm1436_vm1, %v1428_v56  ;;  %v1569_v56 = vld [vmem:[#allocation2 + $0x80] sm:$0xff] (!%p1830_p8) }
 0x2fb   : > { %1462 = vst.msk [vmem:[#allocation2 + $0xc8] sm:$0xff] %vm1436_vm1, %v1429_v36  ;;  %v1369_v61 = vpop.xlane.xlu0 %1368  ;;  %1691 = vst.msk [vmem:[%s2136_s18 + $0x50] sm:$0xff] (!%p1830_p8), %vm1436_vm1, %v1675_v53 }
 0x2fc   : > { %v1418_v8 = vadd.f32 %v1369_v61, %v1322_v17  ;;  %v1371_v24 = vpop.xlane.xlu1 %1370  ;;  %v1601_v17 = vmul.f32 (!%p1830_p8), 0.00390625, %v1569_v56  ;;  %v1571_v61 = vld [vmem:[#allocation2 + $0x90] sm:$0xff] (!%p1830_p8) }
 0x2fd   : > { %v1419_v63 = vadd.f32 %v1371_v24, %v1323_v19  ;;  %v1561_v2 = vld [vmem:[#allocation2 + $0x40] sm:$0xff] (!%p1830_p8)  ;;  %v1602_v19 = vmul.f32 (!%p1830_p8), 0.00390625, %v1570_v43 }
 0x2fe   : > { %1451 = vst.msk [vmem:[#allocation2 + $0x70] sm:$0xff] %vm1436_vm1, %v1418_v8  ;;  %v1593_v18 = vmul.f32 (!%p1830_p8), 0.00390625, %v1561_v2  ;;  %v1562_v9 = vld [vmem:[#allocation2 + $0x48] sm:$0xff] (!%p1830_p8)  ;;  %v1572_v8 = vld [vmem:[#allocation2 + $0x98] sm:$0xff] (!%p1830_p8)  ;;  %v1573_v24 = vld [vmem:[#allocation2 + $0xa0] sm:$0xff] (!%p1830_p8) }
 0x2ff   : > { %1452 = vst.msk [vmem:[#allocation2 + $0x78] sm:$0xff] %vm1436_vm1, %v1419_v63  ;;  %v1401_v22 = vpop.xlane.xlu0 %1400  ;;  %v1594_v33 = vmul.f32 (!%p1830_p8), 0.00390625, %v1562_v9  ;;  %v1603_v63 = vmul.f32 (!%p1830_p8), 0.00390625, %v1571_v61  ;;  %1633 = vst.msk [vmem:[%s2126_s10 + $0x80] sm:$0xff] (!%p1830_p8), %vm1436_vm1, %v1601_v17  ;;  %v1656_v2 = vld [vmem:[#allocation3 + $0x38] sm:$0xff] (!%p1830_p8)  ;;  %v1673_v9 = vmul.f32 (!%p1830_p8), 0.00390625, %v1657_v51 }
 0x300   : > { %v1434_v20 = vadd.f32 %v1401_v22, %v1338_v31  ;;  %v1403_v27 = vpop.xlane.xlu1 %1402  ;;  %1625 = vst.msk [vmem:[%s2126_s10 + $0x40] sm:$0xff] (!%p1830_p8), %vm1436_vm1, %v1593_v18  ;;  %v1604_v31 = vmul.f32 (!%p1830_p8), 0.00390625, %v1572_v8  ;;  %v1574_v22 = vld [vmem:[#allocation2 + $0xa8] sm:$0xff] (!%p1830_p8)  ;;  %1634 = vst.msk [vmem:[%s2126_s10 + $0x88] sm:$0xff] (!%p1830_p8), %vm1436_vm1, %v1602_v19  ;;  %v1672_v18 = vmul.f32 (!%p1830_p8), 0.00390625, %v1656_v2 }
 0x301   : > { %v1435_v30 = vadd.f32 %v1403_v27, %v1339_v4  ;;  %1626 = vst.msk [vmem:[%s2126_s10 + $0x48] sm:$0xff] (!%p1830_p8), %vm1436_vm1, %v1594_v33  ;;  %v1605_v4 = vmul.f32 (!%p1830_p8), 0.00390625, %v1573_v24  ;;  %v1576_v27 = vld [vmem:[#allocation2 + $0xb8] sm:$0xff] (!%p1830_p8)  ;;  %1635 = vst.msk [vmem:[%s2126_s10 + $0x90] sm:$0xff] (!%p1830_p8), %vm1436_vm1, %v1603_v63 }
 0x302   : > { %1467 = vst.msk [vmem:[#allocation2 + $0xf0] sm:$0xff] %vm1436_vm1, %v1434_v20  ;;  %v1575_v20 = vld [vmem:[#allocation2 + $0xb0] sm:$0xff] (!%p1830_p8)  ;;  %1636 = vst.msk [vmem:[%s2126_s10 + $0x98] sm:$0xff] (!%p1830_p8), %vm1436_vm1, %v1604_v31  ;;  %v1660_v33 = vld [vmem:[#allocation3 + $0x58] sm:$0xff] (!%p1830_p8) }
 0x303   : > { %1468 = vst.msk [vmem:[#allocation2 + $0xf8] sm:$0xff] %vm1436_vm1, %v1435_v30  ;;  %v1365_v41 = vpop.xlane.xlu0 %1364  ;;  %v1606_v30 = vmul.f32 (!%p1830_p8), 0.00390625, %v1574_v22  ;;  %1637 = vst.msk [vmem:[%s2126_s10 + $0xa0] sm:$0xff] (!%p1830_p8), %vm1436_vm1, %v1605_v4 }
 0x304   : > { %v1416_v6 = vadd.f32 %v1365_v41, %v1320_v38  ;;  %v1367_v26 = vpop.xlane.xlu1 %1366  ;;  %v1607_v38 = vmul.f32 (!%p1830_p8), 0.00390625, %v1575_v20  ;;  %v1577_v41 = vld [vmem:[#allocation2 + $0xc0] sm:$0xff] (!%p1830_p8)  ;;  %1688 = vst.msk [vmem:[%s2136_s18 + $0x38] sm:$0xff] (!%p1830_p8), %vm1436_vm1, %v1672_v18  ;;  %1689 = vst.msk [vmem:[%s2136_s18 + $0x40] sm:$0xff] (!%p1830_p8), %vm1436_vm1, %v1673_v9 }
 0x305   : > { %v1417_v15 = vadd.f32 %v1367_v26, %v1321_v55  ;;  %v1567_v1 = vld [vmem:[#allocation2 + $0x70] sm:$0xff] (!%p1830_p8)  ;;  %v1608_v55 = vmul.f32 (!%p1830_p8), 0.00390625, %v1576_v27  ;;  %1638 = vst.msk [vmem:[%s2126_s10 + $0xa8] sm:$0xff] (!%p1830_p8), %vm1436_vm1, %v1606_v30 }
 0x306   : > { %1449 = vst.msk [vmem:[#allocation2 + $0x60] sm:$0xff] %vm1436_vm1, %v1416_v6  ;;  %v1599_v52 = vmul.f32 (!%p1830_p8), 0.00390625, %v1567_v1  ;;  %v1568_v46 = vld [vmem:[#allocation2 + $0x78] sm:$0xff] (!%p1830_p8)  ;;  %v1578_v6 = vld [vmem:[#allocation2 + $0xc8] sm:$0xff] (!%p1830_p8)  ;;  %v1579_v26 = vld [vmem:[#allocation2 + $0xd0] sm:$0xff] (!%p1830_p8) }
 0x307   : > { %1450 = vst.msk [vmem:[#allocation2 + $0x68] sm:$0xff] %vm1436_vm1, %v1417_v15  ;;  %v1397_v11 = vpop.xlane.xlu0 %1396  ;;  %v1600_v36 = vmul.f32 (!%p1830_p8), 0.00390625, %v1568_v46  ;;  %v1609_v15 = vmul.f32 (!%p1830_p8), 0.00390625, %v1577_v41  ;;  %1639 = vst.msk [vmem:[%s2126_s10 + $0xb0] sm:$0xff] (!%p1830_p8), %vm1436_vm1, %v1607_v38  ;;  %v1662_v1 = vld [vmem:[#allocation3 + $0x68] sm:$0xff] (!%p1830_p8) }
 0x308   : > { %v1432_v58 = vadd.f32 %v1397_v11, %v1336_v14  ;;  %v1399_v34 = vpop.xlane.xlu1 %1398  ;;  %1631 = vst.msk [vmem:[%s2126_s10 + $0x70] sm:$0xff] (!%p1830_p8), %vm1436_vm1, %v1599_v52  ;;  %v1610_v14 = vmul.f32 (!%p1830_p8), 0.00390625, %v1578_v6  ;;  %v1580_v11 = vld [vmem:[#allocation2 + $0xd8] sm:$0xff] (!%p1830_p8)  ;;  %1640 = vst.msk [vmem:[%s2126_s10 + $0xb8] sm:$0xff] (!%p1830_p8), %vm1436_vm1, %v1608_v55  ;;  %v1678_v52 = vmul.f32 (!%p1830_p8), 0.00390625, %v1662_v1 }
 0x309   : > { %v1433_v10 = vadd.f32 %v1399_v34, %v1337_v32  ;;  %1552 = sbr.rel (%p1830_p8) target bundleno = 794 (0x31a), region = 48  ;;  %1632 = vst.msk [vmem:[%s2126_s10 + $0x78] sm:$0xff] (!%p1830_p8), %vm1436_vm1, %v1600_v36  ;;  %v1611_v32 = vmul.f32 (!%p1830_p8), 0.00390625, %v1579_v26  ;;  %1641 = vst.msk [vmem:[%s2126_s10 + $0xc0] sm:$0xff] (!%p1830_p8), %vm1436_vm1, %v1609_v15 }
 0x30a   : > { %1465 = vst.msk [vmem:[#allocation2 + $0xe0] sm:$0xff] %vm1436_vm1, %v1432_v58  ;;  %1642 = vst.msk [vmem:[%s2126_s10 + $0xc8] sm:$0xff] (!%p1830_p8), %vm1436_vm1, %v1610_v14 }
 0x30b   : > { %1466 = vst.msk [vmem:[#allocation2 + $0xe8] sm:$0xff] %vm1436_vm1, %v1433_v10  ;;  %v1514_v45 = vpop.xlane.xlu0 %1513  ;;  %v1612_v10 = vmul.f32 (!%p1830_p8), 0.00390625, %v1580_v11  ;;  %1643 = vst.msk [vmem:[%s2126_s10 + $0xd0] sm:$0xff] (!%p1830_p8), %vm1436_vm1, %v1611_v32 }
 0x30c   : > { %v1531_v39 = vadd.f32 %v1514_v45, %v1483_v44  ;;  %v1516_v40 = vpop.xlane.xlu1 %1515  ;;  %v1583_v45 = vld [vmem:[#allocation2 + $0xf0] sm:$0xff] (!%p1830_p8)  ;;  %1694 = vst.msk [vmem:[%s2136_s18 + $0x68] sm:$0xff] (!%p1830_p8), %vm1436_vm1, %v1678_v52 }
 0x30d   : > { %v1532_v12 = vadd.f32 %v1516_v40, %v1484_v54  ;;  %v1565_v3 = vld [vmem:[#allocation2 + $0x60] sm:$0xff] (!%p1830_p8)  ;;  %1644 = vst.msk [vmem:[%s2126_s10 + $0xd8] sm:$0xff] (!%p1830_p8), %vm1436_vm1, %v1612_v10 }
 0x30e   : > { %1547 = vst.msk [vmem:[#allocation3 + $0x70] sm:$0xff] %vm1436_vm1, %v1531_v39  ;;  %v1566_v37 = vld [vmem:[#allocation2 + $0x68] sm:$0xff] (!%p1830_p8)  ;;  %v1597_v47 = vmul.f32 (!%p1830_p8), 0.00390625, %v1565_v3  ;;  %v1584_v39 = vld [vmem:[#allocation2 + $0xf8] sm:$0xff] (!%p1830_p8)  ;;  %v1649_v40 = vld [vmem:[#allocation3] sm:$0xff] (!%p1830_p8)  ;;  %v1676_v3 = vmul.f32 (!%p1830_p8), 0.00390625, %v1660_v33 }
 0x30f   : > { %1548 = vst.msk [vmem:[#allocation3 + $0x78] sm:$0xff] %vm1436_vm1, %v1532_v12  ;;  %v1598_v13 = vmul.f32 (!%p1830_p8), 0.00390625, %v1566_v37  ;;  %v1615_v12 = vmul.f32 (!%p1830_p8), 0.00390625, %v1583_v45  ;;  %v1616_v0 = vmul.f32 (!%p1830_p8), 0.00390625, %v1584_v39  ;;  %v1665_v42 = vmul.f32 (!%p1830_p8), 0.00390625, %v1649_v40 }
 0x310   : > { %1629 = vst.msk [vmem:[%s2126_s10 + $0x60] sm:$0xff] %vm1436_vm1, %v1597_v47  ;;  %v1677_v37 = vmul.f32 0.00390625, %v1661_v57  ;;  %1692 = vst.msk [vmem:[%s2136_s18 + $0x58] sm:$0xff] %vm1436_vm1, %v1676_v3 }
 0x311   : > { %1630 = vst.msk [vmem:[%s2126_s10 + $0x68] sm:$0xff] %vm1436_vm1, %v1598_v13  ;;  %v1581_v58 = vld [vmem:[#allocation2 + $0xe0] sm:$0xff]  ;;  %1647 = vst.msk [vmem:[%s2126_s10 + $0xf0] sm:$0xff] %vm1436_vm1, %v1615_v12 }
 0x312   : > { %v1582_v34 = vld [vmem:[#allocation2 + $0xe8] sm:$0xff]  ;;  %v1613_v44 = vmul.f32 0.00390625, %v1581_v58  ;;  %1648 = vst.msk [vmem:[%s2126_s10 + $0xf8] sm:$0xff] %vm1436_vm1, %v1616_v0  ;;  %1681 = vst.msk [vmem:[%s2136_s18] sm:$0xff] %vm1436_vm1, %v1665_v42 }
 0x313   : > { %v1614_v54 = vmul.f32 0.00390625, %v1582_v34  ;;  %1693 = vst.msk [vmem:[%s2136_s18 + $0x60] sm:$0xff] %vm1436_vm1, %v1677_v37 }
 0x314   : > { %1645 = vst.msk [vmem:[%s2126_s10 + $0xe0] sm:$0xff] %vm1436_vm1, %v1613_v44 }
 0x315   : > { %1646 = vst.msk [vmem:[%s2126_s10 + $0xe8] sm:$0xff] %vm1436_vm1, %v1614_v54  ;;  %v1663_v47 = vld [vmem:[#allocation3 + $0x70] sm:$0xff] }
 0x316   : > { %v1664_v13 = vld [vmem:[#allocation3 + $0x78] sm:$0xff]  ;;  %v1679_v46 = vmul.f32 0.00390625, %v1663_v47 }
 0x317   : > { %v1680_v56 = vmul.f32 0.00390625, %v1664_v13 }
 0x318   : > { %1695 = vst.msk [vmem:[%s2136_s18 + $0x70] sm:$0xff] %vm1436_vm1, %v1679_v46 }
 0x319   : > { %1696 = vst.msk [vmem:[%s2136_s18 + $0x78] sm:$0xff] %vm1436_vm1, %v1680_v56 }
 0x31a PF: > { %s17_s25 = sadd.s32 1, %s2048_s25   ;;  %s2916_s21 = smov %s2040_s23 }
 0x31b   : > { %p14_p9 = scmp.ge.s32.totalorder %s17_s25, 6   ;;  %s2917_s22 = smov %s2044_s24 }
 0x31c   : > { %s2918_s23 = smov %s2921_s26  ;;  %s2919_s24 = smov %s2925_s27 }
 0x31d   :  { %16 = sbr.rel (!%p14_p9) target bundleno = 3 (0x3), region = 90 }

</bundles_post_ra>
